<compile_context>
chip_gen: v5e
topology: v5e:2x2
jax: 0.10.0
libtpu: 0.0.40
codegen_flags: <defaults>
</compile_context>

<pallas_src>
import functools

import jax
import jax.numpy as jnp
from jax.experimental import pallas as pl
from jax.experimental.pallas import tpu as pltpu


def _round_up(x, m):
    return ((x + m - 1) // m) * m


def wgen_kernel(x_ref,
                w1_ref, b1_ref,
                w2_ref, b2_ref,
                w3_ref, b3_ref,
                w4_ref, b4_ref,
                o_ref):
    bf16 = jnp.bfloat16

    # Layer 1: (tb, z) @ (z, 256) + (1, 256), ReLU   (bf16 operands, f32 accum)
    h = jnp.dot(x_ref[...], w1_ref[...], preferred_element_type=jnp.float32)
    h = jnp.maximum(h + b1_ref[...], 0.0)

    # Layer 2: (tb, 256) @ (256, 512) + (1, 512), ReLU
    h = jnp.dot(h.astype(bf16), w2_ref[...], preferred_element_type=jnp.float32)
    h = jnp.maximum(h + b2_ref[...], 0.0)

    # Layer 3: (tb, 512) @ (512, 1024) + (1, 1024), ReLU
    h = jnp.dot(h.astype(bf16), w3_ref[...], preferred_element_type=jnp.float32)
    h = jnp.maximum(h + b3_ref[...], 0.0)

    # Layer 4 (no activation): (tb, 1024) @ (1024, out_pad) + (1, out_pad)
    h = jnp.dot(h.astype(bf16), w4_ref[...], preferred_element_type=jnp.float32)
    o_ref[...] = (h + b4_ref[...]).astype(o_ref.dtype)


@functools.partial(jax.jit, static_argnames=("tile_b",))
def wgen_forward(x, params, *, tile_b=256):
    """x: (B, z_dim) float32. params: w1..w4 in (in,out) layout, b1..b4 as (1,out); all f32."""
    B, z_dim = x.shape
    w1, b1 = params["w1"], params["b1"]
    w2, b2 = params["w2"], params["b2"]
    w3, b3 = params["w3"], params["b3"]
    w4, b4 = params["w4"], params["b4"]
    out_dim = w4.shape[1]

    # --- Pad output feature dim to a multiple of 128 lanes (lane-dense stores).
    out_pad = _round_up(out_dim, 128)
    if out_pad != out_dim:
        w4 = jnp.pad(w4, ((0, 0), (0, out_pad - out_dim)))
        b4 = jnp.pad(b4, ((0, 0), (0, out_pad - out_dim)))

    # --- Cast MXU operands to bf16 once (weights + input); biases remain f32.
    w1b = w1.astype(jnp.bfloat16)
    w2b = w2.astype(jnp.bfloat16)
    w3b = w3.astype(jnp.bfloat16)
    w4b = w4.astype(jnp.bfloat16)

    # --- Batch tile: multiple of 16 sublanes (bf16 packing), capped at tile_b.
    tb = min(_round_up(tile_b, 16), _round_up(max(B, 16), 16))
    B_pad = _round_up(B, tb)
    xp = x if B_pad == B else jnp.pad(x, ((0, B_pad - B), (0, 0)))
    xp = xp.astype(jnp.bfloat16)

    grid = (B_pad // tb,)

    full = lambda a: pl.BlockSpec(a.shape, lambda i: (0, 0))

    flops = 2 * B_pad * (z_dim * 256 + 256 * 512 + 512 * 1024 + 1024 * out_pad)
    bytes_accessed = (
        xp.size * 2                                          # x (bf16)
        + (w1b.size + w2b.size + w3b.size + w4b.size) * 2    # weights (bf16)
        + (b1.size + b2.size + b3.size + b4.size) * 4        # biases (f32)
        + B_pad * out_pad * 4                                # output (f32)
    )

    out = pl.pallas_call(
        wgen_kernel,
        out_shape=jax.ShapeDtypeStruct((B_pad, out_pad), jnp.float32),
        grid_spec=pltpu.PrefetchScalarGridSpec(
            num_scalar_prefetch=0,
            grid=grid,
            in_specs=[
                pl.BlockSpec((tb, z_dim), lambda i: (i, 0)),  # x tile
                full(w1b), full(b1),
                full(w2b), full(b2),
                full(w3b), full(b3),
                full(w4b), full(b4),
            ],
            out_specs=pl.BlockSpec((tb, out_pad), lambda i: (i, 0)),
        ),
        compiler_params=pltpu.CompilerParams(
            dimension_semantics=("parallel",),
        ),
        cost_estimate=pl.CostEstimate(
            flops=flops, transcendentals=0, bytes_accessed=bytes_accessed),
    )(xp, w1b, b1, w2b, b2, w3b, b3, w4b, b4)

    return out[:B, :out_dim]


def init_params(key, z_dim=128, output_dim=128, dtype=jnp.float32):
    """Deterministic synthetic init. Weights in (in, out) layout, biases (1, out)."""
    dims = [z_dim, 256, 512, 1024, output_dim]
    params = {}
    keys = jax.random.split(key, 2 * (len(dims) - 1))
    for li in range(len(dims) - 1):
        fan_in, fan_out = dims[li], dims[li + 1]
        bound = 1.0 / (fan_in ** 0.5)  # matches PyTorch nn.Linear default range
        w = jax.random.uniform(keys[2 * li], (fan_in, fan_out),
                               minval=-bound, maxval=bound, dtype=dtype)
        b = jax.random.uniform(keys[2 * li + 1], (1, fan_out),
                               minval=-bound, maxval=bound, dtype=dtype)
        params[f"w{li + 1}"] = w
        params[f"b{li + 1}"] = b
    return params


def wgen_reference_bf16(x, params):
    """Pure-JAX reference with the same bf16-operand / f32-accumulate recipe."""
    bf16 = jnp.bfloat16
    f32 = jnp.float32
    h = jnp.dot(x.astype(bf16), params["w1"].astype(bf16),
                preferred_element_type=f32) + params["b1"]
    h = jnp.maximum(h, 0.0)
    h = jnp.dot(h.astype(bf16), params["w2"].astype(bf16),
                preferred_element_type=f32) + params["b2"]
    h = jnp.maximum(h, 0.0)
    h = jnp.dot(h.astype(bf16), params["w3"].astype(bf16),
                preferred_element_type=f32) + params["b3"]
    h = jnp.maximum(h, 0.0)
    return jnp.dot(h.astype(bf16), params["w4"].astype(bf16),
                   preferred_element_type=f32) + params["b4"]


def wgen_reference_f32(x, params):
    """Pure-f32 reference (matches the PyTorch module semantics)."""
    h = jnp.maximum(x @ params["w1"] + params["b1"], 0.0)
    h = jnp.maximum(h @ params["w2"] + params["b2"], 0.0)
    h = jnp.maximum(h @ params["w3"] + params["b3"], 0.0)
    return h @ params["w4"] + params["b4"]


if __name__ == "__main__":
    key = jax.random.PRNGKey(0)
    k_param, k_x = jax.random.split(key)

    z_dim, output_dim = 128, 128   # module defaults
    batch = 16                     # small example batch

    params = init_params(k_param, z_dim=z_dim, output_dim=output_dim)
    x = jax.random.normal(k_x, (batch, z_dim), dtype=jnp.float32)

    out = wgen_forward(x, params, tile_b=256)
    out = jax.block_until_ready(out)
    assert out.shape == (batch, output_dim)

    ref_bf16 = wgen_reference_bf16(x, params)
    assert jnp.allclose(out, ref_bf16, atol=5e-3, rtol=5e-3), "mismatch vs bf16 reference"

    ref_f32 = wgen_reference_f32(x, params)
    assert jnp.allclose(out, ref_f32, atol=5e-2, rtol=5e-2), "mismatch vs f32 reference"

    print("KERNEL_OK")
</pallas_src>

<mosaic_0001>
module attributes {stable_mosaic.version = 11 : i64} {
  func.func @wgen_kernel(%arg0: i32, %arg1: memref<16x128xbf16, #tpu.memory_space<vmem>>, %arg2: memref<128x256xbf16, #tpu.memory_space<vmem>>, %arg3: memref<1x256xf32, #tpu.memory_space<vmem>>, %arg4: memref<256x512xbf16, #tpu.memory_space<vmem>>, %arg5: memref<1x512xf32, #tpu.memory_space<vmem>>, %arg6: memref<512x1024xbf16, #tpu.memory_space<vmem>>, %arg7: memref<1x1024xf32, #tpu.memory_space<vmem>>, %arg8: memref<1024x128xbf16, #tpu.memory_space<vmem>>, %arg9: memref<1x128xf32, #tpu.memory_space<vmem>>, %arg10: memref<16x128xf32, #tpu.memory_space<vmem>>) attributes {dimension_semantics = [#tpu.dimension_semantics<parallel>], iteration_bounds = array<i64: 1>, scalar_prefetch = 0 : i64, scratch_operands = 0 : i64, tpu.core_type = #tpu.core_type<tc>, window_params = [{transform_indices = @transform_0, window_bounds = array<i64: 16, 128>}, {pipeline_mode = #tpu.pipeline_mode<synchronous>, transform_indices = @transform_1, window_bounds = array<i64: 128, 256>}, {pipeline_mode = #tpu.pipeline_mode<synchronous>, transform_indices = @transform_2, window_bounds = array<i64: 1, 256>}, {pipeline_mode = #tpu.pipeline_mode<synchronous>, transform_indices = @transform_3, window_bounds = array<i64: 256, 512>}, {pipeline_mode = #tpu.pipeline_mode<synchronous>, transform_indices = @transform_4, window_bounds = array<i64: 1, 512>}, {pipeline_mode = #tpu.pipeline_mode<synchronous>, transform_indices = @transform_5, window_bounds = array<i64: 512, 1024>}, {pipeline_mode = #tpu.pipeline_mode<synchronous>, transform_indices = @transform_6, window_bounds = array<i64: 1, 1024>}, {pipeline_mode = #tpu.pipeline_mode<synchronous>, transform_indices = @transform_7, window_bounds = array<i64: 1024, 128>}, {pipeline_mode = #tpu.pipeline_mode<synchronous>, transform_indices = @transform_8, window_bounds = array<i64: 1, 128>}, {transform_indices = @transform_9, window_bounds = array<i64: 16, 128>}]} {
    %c0 = arith.constant 0 : index
    %c0_0 = arith.constant 0 : index
    %0 = vector.load %arg1[%c0, %c0_0] : memref<16x128xbf16, #tpu.memory_space<vmem>>, vector<16x128xbf16>
    %c0_1 = arith.constant 0 : index
    %c0_2 = arith.constant 0 : index
    %1 = vector.load %arg2[%c0_1, %c0_2] : memref<128x256xbf16, #tpu.memory_space<vmem>>, vector<128x256xbf16>
    %cst = arith.constant dense<0.000000e+00> : vector<16x256xf32>
    %2 = tpu.matmul %0, %1, %cst {dimension_numbers = #tpu.dot_dimension_numbers<[1], [0], [0], [1], [0, 0, 1, 1], [], []>} : vector<16x128xbf16>, vector<128x256xbf16>, vector<16x256xf32> -> vector<16x256xf32>
    %c0_3 = arith.constant 0 : index
    %c0_4 = arith.constant 0 : index
    %3 = vector.load %arg3[%c0_3, %c0_4] : memref<1x256xf32, #tpu.memory_space<vmem>>, vector<1x256xf32>
    %4 = vector.broadcast %3 : vector<1x256xf32> to vector<16x256xf32>
    %5 = arith.addf %2, %4 : vector<16x256xf32>
    %cst_5 = arith.constant 0.000000e+00 : f32
    %6 = vector.broadcast %cst_5 : f32 to vector<16x256xf32>
    %7 = arith.maximumf %5, %6 : vector<16x256xf32>
    %8 = arith.truncf %7 : vector<16x256xf32> to vector<16x256xbf16>
    %c0_6 = arith.constant 0 : index
    %c0_7 = arith.constant 0 : index
    %9 = vector.load %arg4[%c0_6, %c0_7] : memref<256x512xbf16, #tpu.memory_space<vmem>>, vector<256x512xbf16>
    %cst_8 = arith.constant dense<0.000000e+00> : vector<16x512xf32>
    %10 = tpu.matmul %8, %9, %cst_8 {dimension_numbers = #tpu.dot_dimension_numbers<[1], [0], [0], [1], [0, 0, 1, 1], [], []>} : vector<16x256xbf16>, vector<256x512xbf16>, vector<16x512xf32> -> vector<16x512xf32>
    %c0_9 = arith.constant 0 : index
    %c0_10 = arith.constant 0 : index
    %11 = vector.load %arg5[%c0_9, %c0_10] : memref<1x512xf32, #tpu.memory_space<vmem>>, vector<1x512xf32>
    %12 = vector.broadcast %11 : vector<1x512xf32> to vector<16x512xf32>
    %13 = arith.addf %10, %12 : vector<16x512xf32>
    %cst_11 = arith.constant 0.000000e+00 : f32
    %14 = vector.broadcast %cst_11 : f32 to vector<16x512xf32>
    %15 = arith.maximumf %13, %14 : vector<16x512xf32>
    %16 = arith.truncf %15 : vector<16x512xf32> to vector<16x512xbf16>
    %c0_12 = arith.constant 0 : index
    %c0_13 = arith.constant 0 : index
    %17 = vector.load %arg6[%c0_12, %c0_13] : memref<512x1024xbf16, #tpu.memory_space<vmem>>, vector<512x1024xbf16>
    %cst_14 = arith.constant dense<0.000000e+00> : vector<16x1024xf32>
    %18 = tpu.matmul %16, %17, %cst_14 {dimension_numbers = #tpu.dot_dimension_numbers<[1], [0], [0], [1], [0, 0, 1, 1], [], []>} : vector<16x512xbf16>, vector<512x1024xbf16>, vector<16x1024xf32> -> vector<16x1024xf32>
    %c0_15 = arith.constant 0 : index
    %c0_16 = arith.constant 0 : index
    %19 = vector.load %arg7[%c0_15, %c0_16] : memref<1x1024xf32, #tpu.memory_space<vmem>>, vector<1x1024xf32>
    %20 = vector.broadcast %19 : vector<1x1024xf32> to vector<16x1024xf32>
    %21 = arith.addf %18, %20 : vector<16x1024xf32>
    %cst_17 = arith.constant 0.000000e+00 : f32
    %22 = vector.broadcast %cst_17 : f32 to vector<16x1024xf32>
    %23 = arith.maximumf %21, %22 : vector<16x1024xf32>
    %24 = arith.truncf %23 : vector<16x1024xf32> to vector<16x1024xbf16>
    %c0_18 = arith.constant 0 : index
    %c0_19 = arith.constant 0 : index
    %25 = vector.load %arg8[%c0_18, %c0_19] : memref<1024x128xbf16, #tpu.memory_space<vmem>>, vector<1024x128xbf16>
    %cst_20 = arith.constant dense<0.000000e+00> : vector<16x128xf32>
    %26 = tpu.matmul %24, %25, %cst_20 {dimension_numbers = #tpu.dot_dimension_numbers<[1], [0], [0], [1], [0, 0, 1, 1], [], []>} : vector<16x1024xbf16>, vector<1024x128xbf16>, vector<16x128xf32> -> vector<16x128xf32>
    %c0_21 = arith.constant 0 : index
    %c0_22 = arith.constant 0 : index
    %27 = vector.load %arg9[%c0_21, %c0_22] : memref<1x128xf32, #tpu.memory_space<vmem>>, vector<1x128xf32>
    %28 = vector.broadcast %27 : vector<1x128xf32> to vector<16x128xf32>
    %29 = arith.addf %26, %28 : vector<16x128xf32>
    %c0_23 = arith.constant 0 : index
    %c0_24 = arith.constant 0 : index
    %30 = vector.load %arg10[%c0_23, %c0_24] : memref<16x128xf32, #tpu.memory_space<vmem>>, vector<16x128xf32>
    tpu.vector_store %arg10[%c0_23, %c0_24], %29 {strides = array<i32>} : memref<16x128xf32, #tpu.memory_space<vmem>>, vector<16x128xf32>,
    return
  }
  func.func @transform_0(%arg0: i32) -> (i32, i32) {
    %c0_i32 = arith.constant 0 : i32
    %c0_i32_0 = arith.constant 0 : i32
    return %arg0, %c0_i32 : i32, i32
  }
  func.func @transform_1(%arg0: i32) -> (i32, i32) {
    %c0_i32 = arith.constant 0 : i32
    %c0_i32_0 = arith.constant 0 : i32
    %c0_i32_1 = arith.constant 0 : i32
    return %c0_i32, %c0_i32_0 : i32, i32
  }
  func.func @transform_2(%arg0: i32) -> (i32, i32) {
    %c0_i32 = arith.constant 0 : i32
    %c0_i32_0 = arith.constant 0 : i32
    %c0_i32_1 = arith.constant 0 : i32
    return %c0_i32, %c0_i32_0 : i32, i32
  }
  func.func @transform_3(%arg0: i32) -> (i32, i32) {
    %c0_i32 = arith.constant 0 : i32
    %c0_i32_0 = arith.constant 0 : i32
    %c0_i32_1 = arith.constant 0 : i32
    return %c0_i32, %c0_i32_0 : i32, i32
  }
  func.func @transform_4(%arg0: i32) -> (i32, i32) {
    %c0_i32 = arith.constant 0 : i32
    %c0_i32_0 = arith.constant 0 : i32
    %c0_i32_1 = arith.constant 0 : i32
    return %c0_i32, %c0_i32_0 : i32, i32
  }
  func.func @transform_5(%arg0: i32) -> (i32, i32) {
    %c0_i32 = arith.constant 0 : i32
    %c0_i32_0 = arith.constant 0 : i32
    %c0_i32_1 = arith.constant 0 : i32
    return %c0_i32, %c0_i32_0 : i32, i32
  }
  func.func @transform_6(%arg0: i32) -> (i32, i32) {
    %c0_i32 = arith.constant 0 : i32
    %c0_i32_0 = arith.constant 0 : i32
    %c0_i32_1 = arith.constant 0 : i32
    return %c0_i32, %c0_i32_0 : i32, i32
  }
  func.func @transform_7(%arg0: i32) -> (i32, i32) {
    %c0_i32 = arith.constant 0 : i32
    %c0_i32_0 = arith.constant 0 : i32
    %c0_i32_1 = arith.constant 0 : i32
    return %c0_i32, %c0_i32_0 : i32, i32
  }
  func.func @transform_8(%arg0: i32) -> (i32, i32) {
    %c0_i32 = arith.constant 0 : i32
    %c0_i32_0 = arith.constant 0 : i32
    %c0_i32_1 = arith.constant 0 : i32
    return %c0_i32, %c0_i32_0 : i32, i32
  }
  func.func @transform_9(%arg0: i32) -> (i32, i32) {
    %c0_i32 = arith.constant 0 : i32
    %c0_i32_0 = arith.constant 0 : i32
    return %arg0, %c0_i32 : i32, i32
  }
}

</mosaic_0001>

<bundles_post_ra>
// kernel: wgen_forward.1
= control target key start
LH: loop header
LB: loop body
LE: loop exit
PB: predicated region body
PF: predicated region fallthrough
CT: control target
= control target key end

     0   :  { %s7820_s0 = inlined_call_operand.vmem [shape: bf16[16,128], index: 0, kind: input, shape index: {}]   ;;  %s7821_s1 = inlined_call_operand.vmem [shape: bf16[128,256], index: 1, kind: input, shape index: {}]   ;;  %s7822_s2 = inlined_call_operand.vmem [shape: f32[1,256], index: 2, kind: input, shape index: {}]   ;;  %s7823_s3 = inlined_call_operand.vmem [shape: bf16[256,512], index: 3, kind: input, shape index: {}]   ;;  %s7824_s4 = inlined_call_operand.vmem [shape: f32[1,512], index: 4, kind: input, shape index: {}]   ;;  %s7825_s5 = inlined_call_operand.vmem [shape: bf16[512,1024], index: 5, kind: input, shape index: {}]   ;;  %s7826_s6 = inlined_call_operand.vmem [shape: f32[1,1024], index: 6, kind: input, shape index: {}]   ;;  %s7827_s7 = inlined_call_operand.vmem [shape: bf16[1024,128], index: 7, kind: input, shape index: {}]   ;;  %s7828_s8 = inlined_call_operand.vmem [shape: f32[1,128], index: 8, kind: input, shape index: {}]   ;;  %s7829_s9 = inlined_call_operand.hbm [shape: f32[16,128], index: 9, kind: output, shape index: {}]  }
   0x1   :  { %v3431_v0 = vld [vmem:[%s7821_s1 + $0x70] sm:$0xf]  ;;  %v4989_v1 = vld [vmem:[%s7821_s1 + $0x74] sm:$0xf0]  ;;  %v4988_v2 = vld [vmem:[%s7821_s1 + $0x74] sm:$0xf] }
   0x2   :  { %v3432_v3 = vor.u32 %v4989_v1, %v3431_v0  ;;  %v3433_v4 = vld [vmem:[%s7821_s1 + $0x78] sm:$0xf0]  ;;  %v3423_v5 = vld [vmem:[%s7821_s1 + $0x60] sm:$0xf]  ;;  %v4987_v6 = vld [vmem:[%s7821_s1 + $0x64] sm:$0xf0] }
   0x3   :  { %v3436_v7 = vor.u32 %v4988_v2, %v3433_v4  ;;  %v4986_v8 = vld [vmem:[%s7821_s1 + $0x64] sm:$0xf]  ;;  %v3425_v9 = vld [vmem:[%s7821_s1 + $0x68] sm:$0xf0]  ;;  %v3424_v10 = vor.u32 %v4987_v6, %v3423_v5  ;;  %v3415_v12 = vld [vmem:[%s7821_s1 + $0x50] sm:$0xf] }
   0x4   :  { %143 = vmatpush.bf16.msra.mxu0 %v3432_v3  ;;  %v3428_v11 = vor.u32 %v4986_v8, %v3425_v9  ;;  %v4985_v13 = vld [vmem:[%s7821_s1 + $0x54] sm:$0xf0]  ;;  %v4984_v14 = vld [vmem:[%s7821_s1 + $0x54] sm:$0xf]  ;;  %v3417_v15 = vld [vmem:[%s7821_s1 + $0x58] sm:$0xf0] }
   0x5   :  { %157 = vmatpush.bf16.msra.mxu1 %v3436_v7  ;;  %v3416_v16 = vor.u32 %v4985_v13, %v3415_v12  ;;  %v3420_v17 = vor.u32 %v4984_v14, %v3417_v15  ;;  %v3407_v18 = vld [vmem:[%s7821_s1 + $0x40] sm:$0xf]  ;;  %v4983_v19 = vld [vmem:[%s7821_s1 + $0x44] sm:$0xf0]  ;;  %v4982_v20 = vld [vmem:[%s7821_s1 + $0x44] sm:$0xf] }
   0x6   :  { %v3409_v21 = vld [vmem:[%s7821_s1 + $0x48] sm:$0xf0]  ;;  %v3408_v22 = vor.u32 %v4983_v19, %v3407_v18  ;;  %v3551_v23 = vld [vmem:[%s7823_s3 + $0xe0] sm:$0xf]  ;;  %v5020_v24 = vld [vmem:[%s7823_s3 + $0xec] sm:$0xf0] }
   0x7   :  { %v3679_v25 = vld [vmem:[%s7823_s3 + $0x1e0] sm:$0xf]  ;;  %v3412_v26 = vor.u32 %v4982_v20, %v3409_v21  ;;  %v3399_v27 = vld [vmem:[%s7821_s1 + $0x30] sm:$0xf]  ;;  %v4981_v28 = vld [vmem:[%s7821_s1 + $0x34] sm:$0xf0]  ;;  %v3552_v29 = vor.u32 %v5020_v24, %v3551_v23 }
   0x8   :  { %144 = vmatpush.bf16.msra.mxu0 %v3424_v10  ;;  %v5052_v30 = vld [vmem:[%s7823_s3 + $0x1ec] sm:$0xf0]  ;;  %v4980_v31 = vld [vmem:[%s7821_s1 + $0x34] sm:$0xf]  ;;  %v3401_v32 = vld [vmem:[%s7821_s1 + $0x38] sm:$0xf0]  ;;  %v3400_v38 = vor.u32 %v4981_v28, %v3399_v27 }
   0x9   :  { %158 = vmatpush.bf16.msra.mxu1 %v3428_v11  ;;  %v3680_v33 = vor.u32 %v5052_v30, %v3679_v25  ;;  %v3535_v34 = vld [vmem:[%s7823_s3 + $0xc0] sm:$0xf]  ;;  %571 = vmatpush.bf16.msra.mxu2 %v3552_v29  ;;  %v5016_v35 = vld [vmem:[%s7823_s3 + $0xcc] sm:$0xf0]  ;;  %v4979_v40 = vld [vmem:[%s7821_s1 + $0x24] sm:$0xf0]  ;;  %v3404_v43 = vor.u32 %v4980_v31, %v3401_v32 }
   0xa   :  { %v3663_v36 = vld [vmem:[%s7823_s3 + $0x1c0] sm:$0xf]  ;;  %v5048_v37 = vld [vmem:[%s7823_s3 + $0x1cc] sm:$0xf0]  ;;  %v3536_v41 = vor.u32 %v5016_v35, %v3535_v34  ;;  %v4978_v44 = vld [vmem:[%s7821_s1 + $0x24] sm:$0xf] }
   0xb   :  { %v3391_v39 = vld [vmem:[%s7821_s1 + $0x20] sm:$0xf]  ;;  %585 = vmatpush.bf16.msra.mxu3 %v3680_v33  ;;  %v3664_v42 = vor.u32 %v5048_v37, %v3663_v36  ;;  %v5012_v46 = vld [vmem:[%s7823_s3 + $0xac] sm:$0xf0]  ;;  %v3393_v47 = vld [vmem:[%s7821_s1 + $0x28] sm:$0xf0] }
   0xc   :  { %145 = vmatpush.bf16.msra.mxu0 %v3416_v16  ;;  %v3519_v45 = vld [vmem:[%s7823_s3 + $0xa0] sm:$0xf]  ;;  %v5044_v49 = vld [vmem:[%s7823_s3 + $0x1ac] sm:$0xf0]  ;;  %v3392_v51 = vor.u32 %v4979_v40, %v3391_v39  ;;  %v3396_v56 = vor.u32 %v4978_v44, %v3393_v47  ;;  %v4977_v57 = vld [vmem:[%s7821_s1 + $0x14] sm:$0xf0] }
   0xd   :  { %159 = vmatpush.bf16.msra.mxu1 %v3420_v17  ;;  %v3647_v48 = vld [vmem:[%s7823_s3 + $0x1a0] sm:$0xf]  ;;  %572 = vmatpush.bf16.msra.mxu2 %v3536_v41  ;;  %v3520_v50 = vor.u32 %v5012_v46, %v3519_v45  ;;  %v3383_v52 = vld [vmem:[%s7821_s1 + $0x10] sm:$0xf]  ;;  %v4976_v60 = vld [vmem:[%s7821_s1 + $0x14] sm:$0xf] }
   0xe   :  { %v3648_v53 = vor.u32 %v5044_v49, %v3647_v48  ;;  %v3503_v54 = vld [vmem:[%s7823_s3 + $0x80] sm:$0xf]  ;;  %v5008_v55 = vld [vmem:[%s7823_s3 + $0x8c] sm:$0xf0]  ;;  %v3385_v61 = vld [vmem:[%s7821_s1 + $0x18] sm:$0xf0]  ;;  %v3384_v0 = vor.u32 %v4977_v57, %v3383_v52 }
   0xf   :  { %586 = vmatpush.bf16.msra.mxu3 %v3664_v42  ;;  %v3631_v58 = vld [vmem:[%s7823_s3 + $0x180] sm:$0xf]  ;;  %v5040_v59 = vld [vmem:[%s7823_s3 + $0x18c] sm:$0xf0]  ;;  %v3504_v63 = vor.u32 %v5008_v55, %v3503_v54  ;;  %v4975_v1 = vld [vmem:[%s7821_s1 + $0x4] sm:$0xf0]  ;;  %v3388_v5 = vor.u32 %v4976_v60, %v3385_v61 }
  0x10   :  { %146 = vmatpush.bf16.msra.mxu0 %v3408_v22  ;;  %v3375_v62 = vld [vmem:[%s7821_s1] sm:$0xf]  ;;  %v3632_v2 = vor.u32 %v5040_v59, %v3631_v58  ;;  %v5004_v4 = vld [vmem:[%s7823_s3 + $0x6c] sm:$0xf0]  ;;  %v4974_v6 = vld [vmem:[%s7821_s1 + $0x4] sm:$0xf] }
  0x11   :  { %160 = vmatpush.bf16.msra.mxu1 %v3412_v26  ;;  %573 = vmatpush.bf16.msra.mxu2 %v3520_v50  ;;  %v3487_v3 = vld [vmem:[%s7823_s3 + $0x60] sm:$0xf]  ;;  %v5036_v8 = vld [vmem:[%s7823_s3 + $0x16c] sm:$0xf0]  ;;  %v3377_v9 = vld [vmem:[%s7821_s1 + $0x8] sm:$0xf0]  ;;  %v3376_v15 = vor.u32 %v4975_v1, %v3375_v62 }
  0x12   :  { %v3615_v7 = vld [vmem:[%s7823_s3 + $0x160] sm:$0xf]  ;;  %v5018_v10 = vld [vmem:[%s7823_s3 + $0xe4] sm:$0xf]  ;;  %v3553_v11 = vld [vmem:[%s7823_s3 + $0xf0] sm:$0xf0]  ;;  %v3488_v14 = vor.u32 %v5004_v4, %v3487_v3  ;;  %v3380_v19 = vor.u32 %v4974_v6, %v3377_v9 }
  0x13   :  { %587 = vmatpush.bf16.msra.mxu3 %v3648_v53  ;;  %v5050_v12 = vld [vmem:[%s7823_s3 + $0x1e4] sm:$0xf]  ;;  %v3681_v13 = vld [vmem:[%s7823_s3 + $0x1f0] sm:$0xf0]  ;;  %v3616_v16 = vor.u32 %v5036_v8, %v3615_v7  ;;  %v3471_v17 = vld [vmem:[%s7823_s3 + $0x40] sm:$0xf]  ;;  %v3556_v20 = vor.u32 %v5018_v10, %v3553_v11 }
  0x14   :  { %147 = vmatpush.bf16.msra.mxu0 %v3400_v38  ;;  %v5000_v18 = vld [vmem:[%s7823_s3 + $0x4c] sm:$0xf0]  ;;  %v3599_v21 = vld [vmem:[%s7823_s3 + $0x140] sm:$0xf]  ;;  %v3684_v23 = vor.u32 %v5050_v12, %v3681_v13  ;;  %v5014_v24 = vld [vmem:[%s7823_s3 + $0xc4] sm:$0xf] }
  0x15   :  { %161 = vmatpush.bf16.msra.mxu1 %v3404_v43  ;;  %574 = vmatpush.bf16.msra.mxu2 %v3504_v63  ;;  %v5032_v22 = vld [vmem:[%s7823_s3 + $0x14c] sm:$0xf0]  ;;  %v3537_v25 = vld [vmem:[%s7823_s3 + $0xd0] sm:$0xf0]  ;;  %v4973_v26 = vld [vmem:[%s7820_s0] sm:$0xff]  ;;  %v3472_v29 = vor.u32 %v5000_v18, %v3471_v17 }
  0x16   :  { %v5046_v27 = vld [vmem:[%s7823_s3 + $0x1c4] sm:$0xf]  ;;  %v3665_v28 = vld [vmem:[%s7823_s3 + $0x1d0] sm:$0xf0]  ;;  %v3600_v30 = vor.u32 %v5032_v22, %v3599_v21  ;;  %v3455_v31 = vld [vmem:[%s7823_s3 + $0x20] sm:$0xf]  ;;  %v3540_v33 = vor.u32 %v5014_v24, %v3537_v25 }
  0x17   :  { %588 = vmatpush.bf16.msra.mxu3 %v3632_v2  ;;  %v4996_v32 = vld [vmem:[%s7823_s3 + $0x2c] sm:$0xf0]  ;;  %v3583_v34 = vld [vmem:[%s7823_s3 + $0x120] sm:$0xf]  ;;  %v3668_v36 = vor.u32 %v5046_v27, %v3665_v28  ;;  %v5010_v37 = vld [vmem:[%s7823_s3 + $0xa4] sm:$0xf] }
  0x18   :  { %148 = vmatpush.bf16.msra.mxu0 %v3392_v51  ;;  %v5028_v35 = vld [vmem:[%s7823_s3 + $0x12c] sm:$0xf0]  ;;  %v3521_v38 = vld [vmem:[%s7823_s3 + $0xb0] sm:$0xf0] }
  0x19   :  { %162 = vmatpush.bf16.msra.mxu1 %v3396_v56  ;;  %575 = vmatpush.bf16.msra.mxu2 %v3488_v14 }
  0x1b   :  { %589 = vmatpush.bf16.msra.mxu3 %v3616_v16 }
  0x1c   :  { %149 = vmatpush.bf16.msra.mxu0 %v3384_v0 }
  0x1d   :  { %163 = vmatpush.bf16.msra.mxu1 %v3388_v5 }
  0x20   :  { %150 = vmatpush.bf16.msra.mxu0 %v3376_v15 }
  0x21   :  { %164 = vmatpush.bf16.msra.mxu1 %v3380_v19 }
  0x24   :  { %599 = vmatpush.bf16.msrb.mxu0 %v3556_v20 }
  0x25   :  { %613 = vmatpush.bf16.msrb.mxu1 %v3684_v23 }
  0x26   :  { %14 = vsyncpa [#allocation3], 0  ;;  %151 = vmatmul.bf16.vlgmr.msra.gmra.mxu0 %v4973_v26  ;;  %v5042_v39 = vld [vmem:[%s7823_s3 + $0x1a4] sm:$0xf]  ;;  %v3649_v40 = vld [vmem:[%s7823_s3 + $0x1b0] sm:$0xf0]  ;;  %576 = vmatpush.bf16.msra.mxu2 %v3472_v29  ;;  %v3456_v41 = vor.u32 %v4996_v32, %v3455_v31  ;;  %v3584_v42 = vor.u32 %v5028_v35, %v3583_v34  ;;  %v3524_v45 = vor.u32 %v5010_v37, %v3521_v38 }
  0x27   :  { %165 = vmatmul.bf16.vlgmr.msra.gmra.mxu1 %v4973_v26  ;;  %590 = vmatpush.bf16.msra.mxu3 %v3600_v30  ;;  %v3439_v43 = vld [vmem:[%s7823_s3] sm:$0xf]  ;;  %v4992_v44 = vld [vmem:[%s7823_s3 + $0xc] sm:$0xf0]  ;;  %v3652_v48 = vor.u32 %v5042_v39, %v3649_v40  ;;  %v5006_v49 = vld [vmem:[%s7823_s3 + $0x84] sm:$0xf] }
  0x28   :  { %600 = vmatpush.bf16.msrb.mxu0 %v3540_v33  ;;  %v3567_v46 = vld [vmem:[%s7823_s3 + $0x100] sm:$0xf]  ;;  %v5024_v47 = vld [vmem:[%s7823_s3 + $0x10c] sm:$0xf0]  ;;  %v3505_v50 = vld [vmem:[%s7823_s3 + $0x90] sm:$0xf0]  ;;  %v3440_v53 = vor.u32 %v4992_v44, %v3439_v43 }
  0x29   :  { %614 = vmatpush.bf16.msrb.mxu1 %v3668_v36  ;;  %v5038_v51 = vld [vmem:[%s7823_s3 + $0x184] sm:$0xf]  ;;  %v3633_v52 = vld [vmem:[%s7823_s3 + $0x190] sm:$0xf0]  ;;  %v3568_v54 = vor.u32 %v5024_v47, %v3567_v46  ;;  %v3508_v55 = vor.u32 %v5006_v49, %v3505_v50  ;;  %v3559_v17 = vld [vmem:[%s7823_s3 + $0xe8] sm:$0xf] }
  0x2a   :  { %577 = vmatpush.bf16.msra.mxu2 %v3456_v41  ;;  %v3636_v56 = vor.u32 %v5038_v51, %v3633_v52  ;;  %v5002_v57 = vld [vmem:[%s7823_s3 + $0x64] sm:$0xf]  ;;  %v3489_v58 = vld [vmem:[%s7823_s3 + $0x70] sm:$0xf0]  ;;  %v5021_v18 = vld [vmem:[%s7823_s3 + $0xf4] sm:$0xf0] }
  0x2b   :  { %591 = vmatpush.bf16.msra.mxu3 %v3584_v42  ;;  %v5034_v59 = vld [vmem:[%s7823_s3 + $0x164] sm:$0xf]  ;;  %v3617_v60 = vld [vmem:[%s7823_s3 + $0x170] sm:$0xf0]  ;;  %v3492_v61 = vor.u32 %v5002_v57, %v3489_v58  ;;  %v3687_v19 = vld [vmem:[%s7823_s3 + $0x1e8] sm:$0xf]  ;;  %v3560_v20 = vor.u32 %v5021_v18, %v3559_v17 }
  0x2c   :  { %601 = vmatpush.bf16.msrb.mxu0 %v3524_v45  ;;  %v3620_v62 = vor.u32 %v5034_v59, %v3617_v60  ;;  %v4998_v63 = vld [vmem:[%s7823_s3 + $0x44] sm:$0xf]  ;;  %v3473_v0 = vld [vmem:[%s7823_s3 + $0x50] sm:$0xf0]  ;;  %v5053_v21 = vld [vmem:[%s7823_s3 + $0x1f4] sm:$0xf0] }
  0x2d   :  { %615 = vmatpush.bf16.msrb.mxu1 %v3652_v48  ;;  %v5030_v1 = vld [vmem:[%s7823_s3 + $0x144] sm:$0xf]  ;;  %v3601_v2 = vld [vmem:[%s7823_s3 + $0x150] sm:$0xf0]  ;;  %v3476_v3 = vor.u32 %v4998_v63, %v3473_v0  ;;  %v5019_v22 = vld [vmem:[%s7823_s3 + $0xec] sm:$0xf]  ;;  %v3688_v24 = vor.u32 %v5053_v21, %v3687_v19 }
  0x2e   :  { %578 = vmatpush.bf16.msra.mxu2 %v3440_v53  ;;  %v3604_v4 = vor.u32 %v5030_v1, %v3601_v2  ;;  %v4994_v5 = vld [vmem:[%s7823_s3 + $0x24] sm:$0xf]  ;;  %v3457_v6 = vld [vmem:[%s7823_s3 + $0x30] sm:$0xf0]  ;;  %v3561_v23 = vld [vmem:[%s7823_s3 + $0xf8] sm:$0xf0] }
  0x2f   :  { %592 = vmatpush.bf16.msra.mxu3 %v3568_v54  ;;  %v5026_v7 = vld [vmem:[%s7823_s3 + $0x124] sm:$0xf]  ;;  %v3585_v8 = vld [vmem:[%s7823_s3 + $0x130] sm:$0xf0]  ;;  %v3460_v9 = vor.u32 %v4994_v5, %v3457_v6  ;;  %v3564_v25 = vor.u32 %v5019_v22, %v3561_v23  ;;  %v5051_v26 = vld [vmem:[%s7823_s3 + $0x1ec] sm:$0xf] }
  0x30   :  { %602 = vmatpush.bf16.msrb.mxu0 %v3508_v55  ;;  %v3588_v10 = vor.u32 %v5026_v7, %v3585_v8  ;;  %v4990_v11 = vld [vmem:[%s7823_s3 + $0x4] sm:$0xf]  ;;  %v3441_v12 = vld [vmem:[%s7823_s3 + $0x10] sm:$0xf0]  ;;  %v3689_v27 = vld [vmem:[%s7823_s3 + $0x1f8] sm:$0xf0] }
  0x31   :  { %616 = vmatpush.bf16.msrb.mxu1 %v3636_v56  ;;  %v5022_v13 = vld [vmem:[%s7823_s3 + $0x104] sm:$0xf]  ;;  %v3569_v14 = vld [vmem:[%s7823_s3 + $0x110] sm:$0xf0]  ;;  %v3444_v15 = vor.u32 %v4990_v11, %v3441_v12  ;;  %v3692_v28 = vor.u32 %v5051_v26, %v3689_v27  ;;  %v3543_v29 = vld [vmem:[%s7823_s3 + $0xc8] sm:$0xf] }
  0x32   :  { %v3572_v16 = vor.u32 %v5022_v13, %v3569_v14  ;;  %627 = vmatpush.bf16.msrb.mxu2 %v3560_v20  ;;  %v5017_v30 = vld [vmem:[%s7823_s3 + $0xd4] sm:$0xf0]  ;;  %v3671_v32 = vld [vmem:[%s7823_s3 + $0x1c8] sm:$0xf]  ;;  %v5015_v34 = vld [vmem:[%s7823_s3 + $0xcc] sm:$0xf] }
  0x33   :  { %641 = vmatpush.bf16.msrb.mxu3 %v3688_v24  ;;  %v3544_v31 = vor.u32 %v5017_v30, %v3543_v29  ;;  %v5049_v33 = vld [vmem:[%s7823_s3 + $0x1d4] sm:$0xf0]  ;;  %v3545_v36 = vld [vmem:[%s7823_s3 + $0xd8] sm:$0xf0]  ;;  %v5047_v37 = vld [vmem:[%s7823_s3 + $0x1cc] sm:$0xf] }
  0x34   :  { %603 = vmatpush.bf16.msrb.mxu0 %v3492_v61  ;;  %v3672_v35 = vor.u32 %v5049_v33, %v3671_v32  ;;  %v3673_v38 = vld [vmem:[%s7823_s3 + $0x1d8] sm:$0xf0]  ;;  %v3548_v39 = vor.u32 %v5015_v34, %v3545_v36  ;;  %v3527_v41 = vld [vmem:[%s7823_s3 + $0xa8] sm:$0xf]  ;;  %v5013_v42 = vld [vmem:[%s7823_s3 + $0xb4] sm:$0xf0] }
  0x35   :  { %617 = vmatpush.bf16.msrb.mxu1 %v3620_v62  ;;  %v3676_v40 = vor.u32 %v5047_v37, %v3673_v38  ;;  %v3655_v43 = vld [vmem:[%s7823_s3 + $0x1a8] sm:$0xf]  ;;  %v3528_v44 = vor.u32 %v5013_v42, %v3527_v41  ;;  %v5045_v45 = vld [vmem:[%s7823_s3 + $0x1b4] sm:$0xf0]  ;;  %v5011_v46 = vld [vmem:[%s7823_s3 + $0xac] sm:$0xf] }
  0x36   :  { %628 = vmatpush.bf16.msrb.mxu2 %v3544_v31  ;;  %v3529_v47 = vld [vmem:[%s7823_s3 + $0xb8] sm:$0xf0]  ;;  %v3656_v48 = vor.u32 %v5045_v45, %v3655_v43  ;;  %v5043_v50 = vld [vmem:[%s7823_s3 + $0x1ac] sm:$0xf]  ;;  %v3511_v53 = vld [vmem:[%s7823_s3 + $0x88] sm:$0xf] }
  0x37   :  { %642 = vmatpush.bf16.msrb.mxu3 %v3672_v35  ;;  %v3532_v49 = vor.u32 %v5011_v46, %v3529_v47  ;;  %v3657_v51 = vld [vmem:[%s7823_s3 + $0x1b8] sm:$0xf0]  ;;  %v5009_v54 = vld [vmem:[%s7823_s3 + $0x94] sm:$0xf0]  ;;  %v3639_v55 = vld [vmem:[%s7823_s3 + $0x188] sm:$0xf] }
  0x38   :  { %604 = vmatpush.bf16.msrb.mxu0 %v3476_v3  ;;  %v3660_v52 = vor.u32 %v5043_v50, %v3657_v51  ;;  %v3512_v56 = vor.u32 %v5009_v54, %v3511_v53  ;;  %v5041_v57 = vld [vmem:[%s7823_s3 + $0x194] sm:$0xf0]  ;;  %v5007_v58 = vld [vmem:[%s7823_s3 + $0x8c] sm:$0xf]  ;;  %v3513_v59 = vld [vmem:[%s7823_s3 + $0x98] sm:$0xf0] }
  0x39   :  { %618 = vmatpush.bf16.msrb.mxu1 %v3604_v4  ;;  %v3640_v60 = vor.u32 %v5041_v57, %v3639_v55  ;;  %v3516_v61 = vor.u32 %v5007_v58, %v3513_v59  ;;  %v5039_v62 = vld [vmem:[%s7823_s3 + $0x18c] sm:$0xf]  ;;  %v3641_v63 = vld [vmem:[%s7823_s3 + $0x198] sm:$0xf0]  ;;  %v3495_v1 = vld [vmem:[%s7823_s3 + $0x68] sm:$0xf] }
  0x3a   :  { %629 = vmatpush.bf16.msrb.mxu2 %v3528_v44  ;;  %v3644_v0 = vor.u32 %v5039_v62, %v3641_v63  ;;  %v5005_v2 = vld [vmem:[%s7823_s3 + $0x74] sm:$0xf0]  ;;  %v3623_v3 = vld [vmem:[%s7823_s3 + $0x168] sm:$0xf]  ;;  %v5003_v6 = vld [vmem:[%s7823_s3 + $0x6c] sm:$0xf] }
  0x3b   :  { %643 = vmatpush.bf16.msrb.mxu3 %v3656_v48  ;;  %v3496_v4 = vor.u32 %v5005_v2, %v3495_v1  ;;  %v5037_v5 = vld [vmem:[%s7823_s3 + $0x174] sm:$0xf0]  ;;  %v3497_v7 = vld [vmem:[%s7823_s3 + $0x78] sm:$0xf0]  ;;  %v3479_v12 = vld [vmem:[%s7823_s3 + $0x48] sm:$0xf] }
  0x3c   :  { %605 = vmatpush.bf16.msrb.mxu0 %v3460_v9  ;;  %v3624_v8 = vor.u32 %v5037_v5, %v3623_v3  ;;  %v3500_v9 = vor.u32 %v5003_v6, %v3497_v7  ;;  %v3625_v11 = vld [vmem:[%s7823_s3 + $0x178] sm:$0xf0]  ;;  %v5001_v14 = vld [vmem:[%s7823_s3 + $0x54] sm:$0xf0]  ;;  %v4999_v19 = vld [vmem:[%s7823_s3 + $0x4c] sm:$0xf] }
  0x3d   :  { %619 = vmatpush.bf16.msrb.mxu1 %v3588_v10  ;;  %v5035_v10 = vld [vmem:[%s7823_s3 + $0x16c] sm:$0xf]  ;;  %v3480_v17 = vor.u32 %v5001_v14, %v3479_v12  ;;  %v3481_v20 = vld [vmem:[%s7823_s3 + $0x58] sm:$0xf0]  ;;  %v3463_v24 = vld [vmem:[%s7823_s3 + $0x28] sm:$0xf] }
  0x3e   :  { %630 = vmatpush.bf16.msrb.mxu2 %v3512_v56  ;;  %v3628_v13 = vor.u32 %v5035_v10, %v3625_v11  ;;  %v5031_v21 = vld [vmem:[%s7823_s3 + $0x14c] sm:$0xf]  ;;  %v3484_v22 = vor.u32 %v4999_v19, %v3481_v20  ;;  %v3609_v23 = vld [vmem:[%s7823_s3 + $0x158] sm:$0xf0]  ;;  %v3591_v27 = vld [vmem:[%s7823_s3 + $0x128] sm:$0xf] }
  0x3f   :  { %644 = vmatpush.bf16.msrb.mxu3 %v3640_v60  ;;  %v3612_v26 = vor.u32 %v5031_v21, %v3609_v23  ;;  %v4995_v29 = vld [vmem:[%s7823_s3 + $0x2c] sm:$0xf]  ;;  %v3465_v31 = vld [vmem:[%s7823_s3 + $0x38] sm:$0xf0]  ;;  %v3447_v35 = vld [vmem:[%s7823_s3 + $0x8] sm:$0xf] }
  0x40   :  { %606 = vmatpush.bf16.msrb.mxu0 %v3444_v15  ;;  %v3607_v15 = vld [vmem:[%s7823_s3 + $0x148] sm:$0xf]  ;;  %v5027_v32 = vld [vmem:[%s7823_s3 + $0x12c] sm:$0xf]  ;;  %v3593_v33 = vld [vmem:[%s7823_s3 + $0x138] sm:$0xf0]  ;;  %v3468_v37 = vor.u32 %v4995_v29, %v3465_v31 }
  0x41   :  { %620 = vmatpush.bf16.msrb.mxu1 %v3572_v16  ;;  %v5033_v16 = vld [vmem:[%s7823_s3 + $0x154] sm:$0xf0]  ;;  %v3596_v38 = vor.u32 %v5027_v32, %v3593_v33  ;;  %v4991_v41 = vld [vmem:[%s7823_s3 + $0xc] sm:$0xf]  ;;  %v3449_v42 = vld [vmem:[%s7823_s3 + $0x18] sm:$0xf0] }
  0x42   :  { %631 = vmatpush.bf16.msrb.mxu2 %v3496_v4  ;;  %v3608_v18 = vor.u32 %v5033_v16, %v3607_v15  ;;  %v4993_v36 = vld [vmem:[%s7823_s3 + $0x14] sm:$0xf0]  ;;  %v5023_v43 = vld [vmem:[%s7823_s3 + $0x10c] sm:$0xf]  ;;  %v3577_v44 = vld [vmem:[%s7823_s3 + $0x118] sm:$0xf0]  ;;  %v3452_v47 = vor.u32 %v4991_v41, %v3449_v42 }
  0x43   :  { %645 = vmatpush.bf16.msrb.mxu3 %v3624_v8  ;;  %v3448_v45 = vor.u32 %v4993_v36, %v3447_v35  ;;  %v3580_v48 = vor.u32 %v5023_v43, %v3577_v44  ;;  %v4175_v59 = vld [vmem:[%s7825_s5 + $0x3c0] sm:$0xf]  ;;  %s3357_s13 = sshll.u32 %s7829_s9, 4  ;;  %s5405_s14 = smov 128   ;;  %s3358_s13 = int_to_ptr.hbm [resolvable:$true] %s3357_s13 }
  0x44   :  { %655 = vmatpush.bf16.msra.mxu0 %v3564_v25  ;;  %v4997_v25 = vld [vmem:[%s7823_s3 + $0x34] sm:$0xf0]  ;;  %v5178_v60 = vld [vmem:[%s7825_s5 + $0x3dc] sm:$0xf0] }
  0x45   :  { %669 = vmatpush.bf16.msra.mxu1 %v3692_v28  ;;  %v5029_v28 = vld [vmem:[%s7823_s3 + $0x134] sm:$0xf0]  ;;  %v3464_v30 = vor.u32 %v4997_v25, %v3463_v24  ;;  %v5114_v63 = vld [vmem:[%s7825_s5 + $0x1dc] sm:$0xf0] }
  0x46   :  { %632 = vmatpush.bf16.msrb.mxu2 %v3480_v17  ;;  %v3592_v34 = vor.u32 %v5029_v28, %v3591_v27  ;;  %v5306_v1 = vld [vmem:[%s7825_s5 + $0x7dc] sm:$0xf0] }
  0x47   :  { %646 = vmatpush.bf16.msrb.mxu3 %v3608_v18  ;;  %v4431_v4 = vld [vmem:[%s7825_s5 + $0x5c0] sm:$0xf] }
  0x48   :  { %656 = vmatpush.bf16.msra.mxu0 %v3548_v39  ;;  %v3575_v39 = vld [vmem:[%s7823_s3 + $0x108] sm:$0xf]  ;;  %v5242_v5 = vld [vmem:[%s7825_s5 + $0x5dc] sm:$0xf0] }
  0x49   :  { %670 = vmatpush.bf16.msra.mxu1 %v3676_v40  ;;  %v5025_v40 = vld [vmem:[%s7823_s3 + $0x114] sm:$0xf0]  ;;  %v4143_v10 = vld [vmem:[%s7825_s5 + $0x380] sm:$0xf]  ;;  %v4432_v18 = vor.u32 %v5242_v5, %v4431_v4 }
  0x4a   :  { %633 = vmatpush.bf16.msrb.mxu2 %v3464_v30  ;;  %v3576_v46 = vor.u32 %v5025_v40, %v3575_v39  ;;  %v5170_v11 = vld [vmem:[%s7825_s5 + $0x39c] sm:$0xf0] }
  0x4b   :  { %647 = vmatpush.bf16.msrb.mxu3 %v3592_v34  ;;  %v3887_v14 = vld [vmem:[%s7825_s5 + $0x180] sm:$0xf] }
  0x4c   :  { %657 = vmatpush.bf16.msra.mxu0 %v3532_v49  ;;  %v51_v49 = vld [vmem:[%s7822_s2] sm:$0x3] }
  0x4d   :  { %671 = vmatpush.bf16.msra.mxu1 %v3660_v52  ;;  %v53_v52 = vperm.slane %v51_v49, 0  ;;  %v54_v53 = vperm.slane %v51_v49, 1  ;;  %v5106_v15 = vld [vmem:[%s7825_s5 + $0x19c] sm:$0xf0] }
  0x4e   :  { %634 = vmatpush.bf16.msrb.mxu2 %v3448_v45  ;;  %v4655_v17 = vld [vmem:[%s7825_s5 + $0x780] sm:$0xf]  ;;  %v3888_v25 = vor.u32 %v5106_v15, %v3887_v14 }
  0x4f   :  { %648 = vmatpush.bf16.msrb.mxu3 %v3576_v46  ;;  %v5298_v19 = vld [vmem:[%s7825_s5 + $0x79c] sm:$0xf0] }
  0x50   :  { %658 = vmatpush.bf16.msra.mxu0 %v3516_v61  ;;  %v3919_v61 = vld [vmem:[%s7825_s5 + $0x1c0] sm:$0xf]  ;;  %v4656_v28 = vor.u32 %v5298_v19, %v4655_v17  ;;  %v5174_v17 = vld [vmem:[%s7825_s5 + $0x3c4] sm:$0xf] }
  0x51   :  { %672 = vmatpush.bf16.msra.mxu1 %v3644_v0  ;;  %v4687_v0 = vld [vmem:[%s7825_s5 + $0x7c0] sm:$0xf]  ;;  %v3920_v12 = vor.u32 %v5114_v63, %v3919_v61 }
  0x52   :  { %v4688_v16 = vor.u32 %v5306_v1, %v4687_v0  ;;  %v4399_v20 = vld [vmem:[%s7825_s5 + $0x580] sm:$0xf] }
  0x53   :  { %v5234_v21 = vld [vmem:[%s7825_s5 + $0x59c] sm:$0xf0] }
  0x54   :  { %659 = vmatpush.bf16.msra.mxu0 %v3500_v9  ;;  %v4176_v9 = vor.u32 %v5178_v60, %v4175_v59  ;;  %v4111_v23 = vld [vmem:[%s7825_s5 + $0x340] sm:$0xf]  ;;  %v4400_v30 = vor.u32 %v5234_v21, %v4399_v20  ;;  %v4177_v21 = vld [vmem:[%s7825_s5 + $0x3e0] sm:$0xf0] }
  0x55   :  { %673 = vmatpush.bf16.msra.mxu1 %v3628_v13  ;;  %v5162_v24 = vld [vmem:[%s7825_s5 + $0x35c] sm:$0xf0] }
  0x56   :  { %v5098_v27 = vld [vmem:[%s7825_s5 + $0x15c] sm:$0xf0]  ;;  %v4112_v34 = vor.u32 %v5162_v24, %v4111_v23  ;;  %v3921_v23 = vld [vmem:[%s7825_s5 + $0x1e0] sm:$0xf0] }
  0x57   :  { %v4623_v29 = vld [vmem:[%s7825_s5 + $0x740] sm:$0xf] }
  0x58   :  { %660 = vmatpush.bf16.msra.mxu0 %v3484_v22  ;;  %v4144_v22 = vor.u32 %v5170_v11, %v4143_v10  ;;  %v5290_v31 = vld [vmem:[%s7825_s5 + $0x75c] sm:$0xf0] }
  0x59   :  { %674 = vmatpush.bf16.msra.mxu1 %v3612_v26  ;;  %v3855_v26 = vld [vmem:[%s7825_s5 + $0x140] sm:$0xf]  ;;  %v4624_v40 = vor.u32 %v5290_v31, %v4623_v29  ;;  %v4145_v29 = vld [vmem:[%s7825_s5 + $0x3a0] sm:$0xf0] }
  0x5a   :  { %v4367_v32 = vld [vmem:[%s7825_s5 + $0x540] sm:$0xf]  ;;  %v3889_v31 = vld [vmem:[%s7825_s5 + $0x1a0] sm:$0xf0] }
  0x5b   :  { %v5226_v33 = vld [vmem:[%s7825_s5 + $0x55c] sm:$0xf0] }
  0x5c   :  { %661 = vmatpush.bf16.msra.mxu0 %v3468_v37  ;;  %v4079_v35 = vld [vmem:[%s7825_s5 + $0x300] sm:$0xf]  ;;  %v3856_v37 = vor.u32 %v5098_v27, %v3855_v26  ;;  %v4368_v42 = vor.u32 %v5226_v33, %v4367_v32  ;;  %v4180_v26 = vor.u32 %v5174_v17, %v4177_v21  ;;  %v5166_v27 = vld [vmem:[%s7825_s5 + $0x384] sm:$0xf] }
  0x5d   :  { %675 = vmatpush.bf16.msra.mxu1 %v3596_v38  ;;  %v5154_v36 = vld [vmem:[%s7825_s5 + $0x31c] sm:$0xf0]  ;;  %v4148_v32 = vor.u32 %v5166_v27, %v4145_v29 }
  0x5e   :  { %v3823_v38 = vld [vmem:[%s7825_s5 + $0x100] sm:$0xf]  ;;  %v4080_v46 = vor.u32 %v5154_v36, %v4079_v35  ;;  %v4113_v35 = vld [vmem:[%s7825_s5 + $0x360] sm:$0xf0] }
  0x5f   :  { %v5090_v39 = vld [vmem:[%s7825_s5 + $0x11c] sm:$0xf0] }
  0x60   :  { %662 = vmatpush.bf16.msra.mxu0 %v3452_v47  ;;  %v4591_v41 = vld [vmem:[%s7825_s5 + $0x700] sm:$0xf]  ;;  %v3824_v49 = vor.u32 %v5090_v39, %v3823_v38  ;;  %v4081_v38 = vld [vmem:[%s7825_s5 + $0x320] sm:$0xf0] }
  0x61   :  { %676 = vmatpush.bf16.msra.mxu1 %v3580_v48  ;;  %v5282_v43 = vld [vmem:[%s7825_s5 + $0x71c] sm:$0xf0] }
  0x62   :  { %v4335_v44 = vld [vmem:[%s7825_s5 + $0x500] sm:$0xf] }
  0x63   :  { %v5218_v45 = vld [vmem:[%s7825_s5 + $0x51c] sm:$0xf0] }
  0x64   :  { %v4047_v47 = vld [vmem:[%s7825_s5 + $0x2c0] sm:$0xf] }
  0x65   :  { %v5146_v48 = vld [vmem:[%s7825_s5 + $0x2dc] sm:$0xf0] }
  0x66   :  { %v4015_v59 = vld [vmem:[%s7825_s5 + $0x280] sm:$0xf] }
  0x67   :  { %v5138_v61 = vld [vmem:[%s7825_s5 + $0x29c] sm:$0xf0] }
  0x68   :  { %v5074_v63 = vld [vmem:[%s7825_s5 + $0x9c] sm:$0xf0]  ;;  %v4016_v4 = vor.u32 %v5138_v61, %v4015_v59  ;;  %v3825_v59 = vld [vmem:[%s7825_s5 + $0x120] sm:$0xf0] }
  0x69   :  { %v3983_v5 = vld [vmem:[%s7825_s5 + $0x240] sm:$0xf]  ;;  %v5134_v61 = vld [vmem:[%s7825_s5 + $0x284] sm:$0xf] }
  0x6a   :  { %v4495_v11 = vld [vmem:[%s7825_s5 + $0x640] sm:$0xf] }
  0x6b   :  { %v3951_v14 = vld [vmem:[%s7825_s5 + $0x200] sm:$0xf] }
  0x6c   :  { %v5122_v15 = vld [vmem:[%s7825_s5 + $0x21c] sm:$0xf0] }
  0x6d   :  { %v5058_v19 = vld [vmem:[%s7825_s5 + $0x1c] sm:$0xf0]  ;;  %v3952_v24 = vor.u32 %v5122_v15, %v3951_v14  ;;  %v5286_v14 = vld [vmem:[%s7825_s5 + $0x744] sm:$0xf] }
  0xa3   :  { %v152_v50 = vpop.f32.mrf.mxu0 }
  0xa4   :  { %v166_v51 = vpop.f32.mrf.mxu1  ;;  %v153_v54 = vadd.f32 %v152_v50, %v53_v52  ;;  %v3791_v50 = vld [vmem:[%s7825_s5 + $0xc0] sm:$0xf] }
  0xa5   :  { %v167_v55 = vadd.f32 %v166_v51, %v54_v53  ;;  %v5082_v51 = vld [vmem:[%s7825_s5 + $0xdc] sm:$0xf0] }
  0xa6   :  { %v171_v2 = vmax.f32 %v153_v54, 0.0  ;;  %v4336_v54 = vor.u32 %v5218_v45, %v4335_v44  ;;  %v3792_v60 = vor.u32 %v5082_v51, %v3791_v50  ;;  %v3857_v44 = vld [vmem:[%s7825_s5 + $0x160] sm:$0xf0] }
  0xa7   :  { %v172_v6 = vmax.f32 %v167_v55, 0.0  ;;  %v5274_v55 = vld [vmem:[%s7825_s5 + $0x6dc] sm:$0xf0]  ;;  %v4049_v50 = vld [vmem:[%s7825_s5 + $0x2e0] sm:$0xf0] }
  0xa8   :  { %v5302_v51 = vld [vmem:[%s7825_s5 + $0x7c4] sm:$0xf] }
  0xab   :  { %v154_v56 = vpop.f32.mrf.mxu0 }
  0xac   :  { %v155_v57 = vadd.f32 %v154_v56, %v53_v52  ;;  %v168_v58 = vpop.f32.mrf.mxu1  ;;  %v4592_v52 = vor.u32 %v5282_v43, %v4591_v41  ;;  %v4303_v56 = vld [vmem:[%s7825_s5 + $0x4c0] sm:$0xf]  ;;  %v5094_v43 = vld [vmem:[%s7825_s5 + $0x144] sm:$0xf] }
  0xad   :  { %v169_v62 = vadd.f32 %v168_v58, %v54_v53  ;;  %v4559_v53 = vld [vmem:[%s7825_s5 + $0x6c0] sm:$0xf]  ;;  %v4048_v58 = vor.u32 %v5146_v48, %v4047_v47  ;;  %v3860_v45 = vor.u32 %v5094_v43, %v3857_v44  ;;  %v4337_v43 = vld [vmem:[%s7825_s5 + $0x520] sm:$0xf0] }
  0xae   :  { %v173_v3 = vmax.f32 %v155_v57, 0.0  ;;  %v5210_v57 = vld [vmem:[%s7825_s5 + $0x4dc] sm:$0xf0]  ;;  %v4560_v0 = vor.u32 %v5274_v55, %v4559_v53  ;;  %v4689_v53 = vld [vmem:[%s7825_s5 + $0x7e0] sm:$0xf0] }
  0xaf   :  { %v174_v7 = vmax.f32 %v169_v62, 0.0  ;;  %v3759_v62 = vld [vmem:[%s7825_s5 + $0x80] sm:$0xf]  ;;  %v4304_v1 = vor.u32 %v5210_v57, %v4303_v56  ;;  %v4692_v56 = vor.u32 %v5302_v51, %v4689_v53  ;;  %v5254_v51 = vld [vmem:[%s7825_s5 + $0x644] sm:$0xf] }
  0xb0   :  { %v5967_v8 = vpack.c.bf16 %v173_v3, %v171_v2  ;;  %v4527_v2 = vld [vmem:[%s7825_s5 + $0x680] sm:$0xf] }
  0xb1   :  { %v5975_v13 = vpack.c.bf16 %v174_v7, %v172_v6  ;;  %v5266_v3 = vld [vmem:[%s7825_s5 + $0x69c] sm:$0xf0]  ;;  %v3760_v6 = vor.u32 %v5074_v63, %v3759_v62  ;;  %v4017_v62 = vld [vmem:[%s7825_s5 + $0x2a0] sm:$0xf0] }
  0xb2   :  { %579 = vmatmul.bf16.vlgmr.msra.gmra.mxu2 %v5967_v8  ;;  %607 = vmatmul.bf16.vlgmr.msrb.gmra.mxu0 %v5967_v8  ;;  %v5130_v7 = vld [vmem:[%s7825_s5 + $0x25c] sm:$0xf0]  ;;  %v4528_v10 = vor.u32 %v5266_v3, %v4527_v2  ;;  %v5294_v63 = vld [vmem:[%s7825_s5 + $0x784] sm:$0xf] }
  0xb3   :  { %593 = vmatmul.bf16.vlgmr.msra.gmra.mxu3 %v5975_v13  ;;  %621 = vmatmul.bf16.vlgmr.msrb.gmra.mxu1 %v5975_v13  ;;  %v5202_v41 = vld [vmem:[%s7825_s5 + $0x49c] sm:$0xf0] }
  0xb4   :  { %2263 = vmatpush.bf16.msra.mxu3 %v4176_v9  ;;  %2249 = vmatpush.bf16.msra.mxu2 %v3920_v12  ;;  %v5066_v9 = vld [vmem:[%s7825_s5 + $0x5c] sm:$0xf0] }
  0xb5   :  { %2291 = vmatpush.bf16.msrb.mxu1 %v4688_v16  ;;  %2277 = vmatpush.bf16.msrb.mxu0 %v4432_v18  ;;  %v5258_v12 = vld [vmem:[%s7825_s5 + $0x65c] sm:$0xf0] }
  0xb6   :  { %v3695_v18 = vld [vmem:[%s7825_s5] sm:$0xf]  ;;  %v4496_v20 = vor.u32 %v5258_v12, %v4495_v11  ;;  %v5126_v12 = vld [vmem:[%s7825_s5 + $0x244] sm:$0xf] }
  0xb7   :  { %v5250_v47 = vld [vmem:[%s7825_s5 + $0x61c] sm:$0xf0] }
  0xb8   :  { %2264 = vmatpush.bf16.msra.mxu3 %v4144_v22  ;;  %2250 = vmatpush.bf16.msra.mxu2 %v3888_v25  ;;  %v5110_v22 = vld [vmem:[%s7825_s5 + $0x1c4] sm:$0xf]  ;;  %v3696_v25 = vor.u32 %v5058_v19, %v3695_v18  ;;  %v5194_v55 = vld [vmem:[%s7825_s5 + $0x45c] sm:$0xf0] }
  0xb9   :  { %2292 = vmatpush.bf16.msrb.mxu1 %v4656_v28  ;;  %2278 = vmatpush.bf16.msrb.mxu0 %v4400_v30  ;;  %v3924_v28 = vor.u32 %v5110_v22, %v3921_v23  ;;  %v5102_v30 = vld [vmem:[%s7825_s5 + $0x184] sm:$0xf]  ;;  %v4207_v2 = vld [vmem:[%s7825_s5 + $0x400] sm:$0xf] }
  0xba   :  { %v3892_v33 = vor.u32 %v5102_v30, %v3889_v31  ;;  %v5186_v3 = vld [vmem:[%s7825_s5 + $0x41c] sm:$0xf0]  ;;  %v5070_v18 = vld [vmem:[%s7825_s5 + $0x84] sm:$0xf] }
  0xbb   :  { %v3761_v19 = vld [vmem:[%s7825_s5 + $0xa0] sm:$0xf0] }
  0xbc   :  { %2265 = vmatpush.bf16.msra.mxu3 %v4112_v34  ;;  %2251 = vmatpush.bf16.msra.mxu2 %v3856_v37  ;;  %v5158_v34 = vld [vmem:[%s7825_s5 + $0x344] sm:$0xf]  ;;  %v3764_v21 = vor.u32 %v5070_v18, %v3761_v19 }
  0xbd   :  { %2293 = vmatpush.bf16.msrb.mxu1 %v4624_v40  ;;  %2279 = vmatpush.bf16.msrb.mxu0 %v4368_v42  ;;  %v4116_v36 = vor.u32 %v5158_v34, %v4113_v35  ;;  %v5150_v37 = vld [vmem:[%s7825_s5 + $0x304] sm:$0xf]  ;;  %v4271_v40 = vld [vmem:[%s7825_s5 + $0x480] sm:$0xf] }
  0xbe   :  { %v4084_v39 = vor.u32 %v5150_v37, %v4081_v38  ;;  %v4272_v42 = vor.u32 %v5202_v41, %v4271_v40  ;;  %v4401_v22 = vld [vmem:[%s7825_s5 + $0x5a0] sm:$0xf0] }
  0xbf   :  { %v5062_v30 = vld [vmem:[%s7825_s5 + $0x44] sm:$0xf] }
  0xc0   :  { %2266 = vmatpush.bf16.msra.mxu3 %v4080_v46  ;;  %2252 = vmatpush.bf16.msra.mxu2 %v3824_v49  ;;  %v4463_v46 = vld [vmem:[%s7825_s5 + $0x600] sm:$0xf]  ;;  %v5142_v49 = vld [vmem:[%s7825_s5 + $0x2c4] sm:$0xf] }
  0xc1   :  { %2294 = vmatpush.bf16.msrb.mxu1 %v4592_v52  ;;  %2280 = vmatpush.bf16.msrb.mxu0 %v4336_v54  ;;  %v4464_v48 = vor.u32 %v5250_v47, %v4463_v46  ;;  %v4052_v52 = vor.u32 %v5142_v49, %v4049_v50  ;;  %v4239_v54 = vld [vmem:[%s7825_s5 + $0x440] sm:$0xf]  ;;  %v3729_v31 = vld [vmem:[%s7825_s5 + $0x60] sm:$0xf0] }
  0xc2   :  { %635 = vmatmul.bf16.vlgmr.msrb.gmra.mxu2 %v5967_v8  ;;  %663 = vmatmul.bf16.vlgmr.msra.gmra.mxu0 %v5967_v8  ;;  %v3727_v8 = vld [vmem:[%s7825_s5 + $0x40] sm:$0xf]  ;;  %v4240_v57 = vor.u32 %v5194_v55, %v4239_v54  ;;  %v4369_v34 = vld [vmem:[%s7825_s5 + $0x560] sm:$0xf0] }
  0xc3   :  { %649 = vmatmul.bf16.vlgmr.msrb.gmra.mxu3 %v5975_v13  ;;  %677 = vmatmul.bf16.vlgmr.msra.gmra.mxu1 %v5975_v13  ;;  %v3984_v13 = vor.u32 %v5130_v7, %v3983_v5  ;;  %v3728_v16 = vor.u32 %v5066_v9, %v3727_v8  ;;  %v4208_v5 = vor.u32 %v5186_v3, %v4207_v2  ;;  %v3793_v7 = vld [vmem:[%s7825_s5 + $0xe0] sm:$0xf0] }
  0xc4   :  { %2267 = vmatpush.bf16.msra.mxu3 %v4048_v58  ;;  %2253 = vmatpush.bf16.msra.mxu2 %v3792_v60  ;;  %v5086_v58 = vld [vmem:[%s7825_s5 + $0x104] sm:$0xf] }
  0xc5   :  { %2295 = vmatpush.bf16.msrb.mxu1 %v4560_v0  ;;  %2281 = vmatpush.bf16.msrb.mxu0 %v4304_v1  ;;  %v3828_v60 = vor.u32 %v5086_v58, %v3825_v59  ;;  %v4020_v0 = vor.u32 %v5134_v61, %v4017_v62  ;;  %v4657_v1 = vld [vmem:[%s7825_s5 + $0x7a0] sm:$0xf0] }
  0xc6   :  { %v5238_v8 = vld [vmem:[%s7825_s5 + $0x5c4] sm:$0xf] }
  0xc7   :  { %v4561_v37 = vld [vmem:[%s7825_s5 + $0x6e0] sm:$0xf0] }
  0xc8   :  { %2268 = vmatpush.bf16.msra.mxu3 %v4016_v4  ;;  %2254 = vmatpush.bf16.msra.mxu2 %v3760_v6  ;;  %v4660_v4 = vor.u32 %v5294_v63, %v4657_v1  ;;  %v5078_v6 = vld [vmem:[%s7825_s5 + $0xc4] sm:$0xf] }
  0xc9   :  { %2296 = vmatpush.bf16.msrb.mxu1 %v4528_v10  ;;  %2282 = vmatpush.bf16.msrb.mxu0 %v4272_v42  ;;  %v3796_v9 = vor.u32 %v5078_v6, %v3793_v7  ;;  %v4433_v10 = vld [vmem:[%s7825_s5 + $0x5e0] sm:$0xf0] }
  0xca   :  { %v4436_v11 = vor.u32 %v5238_v8, %v4433_v10  ;;  %v3697_v40 = vld [vmem:[%s7825_s5 + $0x20] sm:$0xf0] }
  0xcb   :  { %v5214_v41 = vld [vmem:[%s7825_s5 + $0x504] sm:$0xf] }
  0xcc   :  { %2269 = vmatpush.bf16.msra.mxu3 %v3984_v13  ;;  %2255 = vmatpush.bf16.msra.mxu2 %v3728_v16  ;;  %v3985_v13 = vld [vmem:[%s7825_s5 + $0x260] sm:$0xf0]  ;;  %v4340_v44 = vor.u32 %v5214_v41, %v4337_v43  ;;  %v5107_v43 = vld [vmem:[%s7825_s5 + $0x1a4] sm:$0xf0] }
  0xcd   :  { %2297 = vmatpush.bf16.msrb.mxu1 %v4496_v20  ;;  %2283 = vmatpush.bf16.msrb.mxu0 %v4240_v57  ;;  %v3988_v15 = vor.u32 %v5126_v12, %v3985_v13  ;;  %v4625_v16 = vld [vmem:[%s7825_s5 + $0x760] sm:$0xf0]  ;;  %v6324_v57 = vld [vmem:[%s7824_s4] sm:$0xf] }
  0xce   :  { %v4628_v17 = vor.u32 %v5286_v14, %v4625_v16  ;;  %v5230_v20 = vld [vmem:[%s7825_s5 + $0x584] sm:$0xf]  ;;  %v243_v8 = vperm.slane %v6324_v57, 0  ;;  %v4183_v16 = vld [vmem:[%s7825_s5 + $0x3c8] sm:$0xf] }
  0xcf   :  { %v4404_v23 = vor.u32 %v5230_v20, %v4401_v22  ;;  %v4529_v46 = vld [vmem:[%s7825_s5 + $0x6a0] sm:$0xf0] }
  0xd0   :  { %2270 = vmatpush.bf16.msra.mxu3 %v3952_v24  ;;  %2256 = vmatpush.bf16.msra.mxu2 %v3696_v25  ;;  %v5118_v24 = vld [vmem:[%s7825_s5 + $0x204] sm:$0xf] }
  0xd1   :  { %2298 = vmatpush.bf16.msrb.mxu1 %v4464_v48  ;;  %2284 = vmatpush.bf16.msrb.mxu0 %v4208_v5  ;;  %v3953_v25 = vld [vmem:[%s7825_s5 + $0x220] sm:$0xf0] }
  0xd2   :  { %v3956_v27 = vor.u32 %v5118_v24, %v3953_v25  ;;  %v5206_v48 = vld [vmem:[%s7825_s5 + $0x4c4] sm:$0xf] }
  0xd3   :  { %v4305_v49 = vld [vmem:[%s7825_s5 + $0x4e0] sm:$0xf0] }
  0xd4   :  { %2319 = vmatpush.bf16.msrb.mxu3 %v4180_v26  ;;  %2305 = vmatpush.bf16.msrb.mxu2 %v3924_v28  ;;  %v5278_v26 = vld [vmem:[%s7825_s5 + $0x704] sm:$0xf]  ;;  %v4308_v50 = vor.u32 %v5206_v48, %v4305_v49  ;;  %v4087_v48 = vld [vmem:[%s7825_s5 + $0x308] sm:$0xf] }
  0xd5   :  { %2347 = vmatpush.bf16.msra.mxu1 %v4692_v56  ;;  %2333 = vmatpush.bf16.msra.mxu0 %v4436_v11  ;;  %v4593_v28 = vld [vmem:[%s7825_s5 + $0x720] sm:$0xf0]  ;;  %v5155_v49 = vld [vmem:[%s7825_s5 + $0x324] sm:$0xf0] }
  0xd6   :  { %v4596_v29 = vor.u32 %v5278_v26, %v4593_v28  ;;  %v5198_v54 = vld [vmem:[%s7825_s5 + $0x484] sm:$0xf]  ;;  %v4151_v26 = vld [vmem:[%s7825_s5 + $0x388] sm:$0xf] }
  0xd7   :  { %v4273_v55 = vld [vmem:[%s7825_s5 + $0x4a0] sm:$0xf0] }
  0xd8   :  { %2320 = vmatpush.bf16.msrb.mxu3 %v4148_v32  ;;  %2306 = vmatpush.bf16.msrb.mxu2 %v3892_v33  ;;  %v3732_v32 = vor.u32 %v5062_v30, %v3729_v31  ;;  %v5222_v33 = vld [vmem:[%s7825_s5 + $0x544] sm:$0xf]  ;;  %v4276_v56 = vor.u32 %v5198_v54, %v4273_v55  ;;  %v246_v30 = vperm.slane %v6324_v57, 3  ;;  %v3863_v54 = vld [vmem:[%s7825_s5 + $0x148] sm:$0xf] }
  0xd9   :  { %2348 = vmatpush.bf16.msra.mxu1 %v4660_v4  ;;  %2334 = vmatpush.bf16.msra.mxu0 %v4404_v23  ;;  %v4372_v35 = vor.u32 %v5222_v33, %v4369_v34  ;;  %v5246_v58 = vld [vmem:[%s7825_s5 + $0x604] sm:$0xf]  ;;  %v5115_v33 = vld [vmem:[%s7825_s5 + $0x1e4] sm:$0xf0] }
  0xda   :  { %v4465_v59 = vld [vmem:[%s7825_s5 + $0x620] sm:$0xf0]  ;;  %v5099_v55 = vld [vmem:[%s7825_s5 + $0x164] sm:$0xf0] }
  0xdb   :  { %v5190_v62 = vld [vmem:[%s7825_s5 + $0x444] sm:$0xf] }
  0xdc   :  { %2321 = vmatpush.bf16.msrb.mxu3 %v4116_v36  ;;  %2307 = vmatpush.bf16.msrb.mxu2 %v3860_v45  ;;  %v5270_v36 = vld [vmem:[%s7825_s5 + $0x6c4] sm:$0xf] }
  0xdd   :  { %2349 = vmatpush.bf16.msra.mxu1 %v4628_v17  ;;  %v4564_v38 = vor.u32 %v5270_v36, %v4561_v37  ;;  %2335 = vmatpush.bf16.msra.mxu0 %v4372_v35  ;;  %v5262_v45 = vld [vmem:[%s7825_s5 + $0x684] sm:$0xf]  ;;  %v5179_v17 = vld [vmem:[%s7825_s5 + $0x3e4] sm:$0xf0] }
  0xde   :  { %v4532_v47 = vor.u32 %v5262_v45, %v4529_v46  ;;  %v4241_v63 = vld [vmem:[%s7825_s5 + $0x460] sm:$0xf0]  ;;  %v4119_v37 = vld [vmem:[%s7825_s5 + $0x348] sm:$0xf]  ;;  %v245_v46 = vperm.slane %v6324_v57, 2 }
  0xdf   :  { %v4244_v2 = vor.u32 %v5190_v62, %v4241_v63  ;;  %v5182_v3 = vld [vmem:[%s7825_s5 + $0x404] sm:$0xf]  ;;  %v4695_v62 = vld [vmem:[%s7825_s5 + $0x7c8] sm:$0xf] }
  0xe0   :  { %2322 = vmatpush.bf16.msrb.mxu3 %v4084_v39  ;;  %2308 = vmatpush.bf16.msrb.mxu2 %v3828_v60  ;;  %v5054_v39 = vld [vmem:[%s7825_s5 + $0x4] sm:$0xf]  ;;  %v4468_v60 = vor.u32 %v5246_v58, %v4465_v59  ;;  %v4055_v58 = vld [vmem:[%s7825_s5 + $0x2c8] sm:$0xf] }
  0xe1   :  { %2350 = vmatpush.bf16.msra.mxu1 %v4596_v29  ;;  %v3700_v42 = vor.u32 %v5054_v39, %v3697_v40  ;;  %2336 = vmatpush.bf16.msra.mxu0 %v4340_v44  ;;  %v4209_v4 = vld [vmem:[%s7825_s5 + $0x420] sm:$0xf0]  ;;  %v5307_v63 = vld [vmem:[%s7825_s5 + $0x7e4] sm:$0xf0] }
  0xe2   :  { %v4212_v6 = vor.u32 %v5182_v3, %v4209_v4  ;;  %v3831_v3 = vld [vmem:[%s7825_s5 + $0x108] sm:$0xf] }
  0xe3   :  { %v5091_v4 = vld [vmem:[%s7825_s5 + $0x124] sm:$0xf0] }
  0xe4   :  { %2323 = vmatpush.bf16.msrb.mxu3 %v4052_v52  ;;  %2309 = vmatpush.bf16.msrb.mxu2 %v3796_v9  ;;  %v4497_v52 = vld [vmem:[%s7825_s5 + $0x660] sm:$0xf0] }
  0xe5   :  { %2351 = vmatpush.bf16.msra.mxu1 %v4564_v38  ;;  %v4500_v53 = vor.u32 %v5254_v51, %v4497_v52  ;;  %2337 = vmatpush.bf16.msra.mxu0 %v4308_v50  ;;  %v5163_v38 = vld [vmem:[%s7825_s5 + $0x364] sm:$0xf0] }
  0xe6   :  { %v4120_v45 = vor.u32 %v5163_v38, %v4119_v37  ;;  %v5235_v37 = vld [vmem:[%s7825_s5 + $0x5a4] sm:$0xf0] }
  0xe8   :  { %2324 = vmatpush.bf16.msrb.mxu3 %v4020_v0  ;;  %2310 = vmatpush.bf16.msrb.mxu2 %v3764_v21  ;;  %v244_v0 = vperm.slane %v6324_v57, 1  ;;  %v4184_v21 = vor.u32 %v5179_v17, %v4183_v16  ;;  %v4088_v57 = vor.u32 %v5155_v49, %v4087_v48  ;;  %v3832_v16 = vor.u32 %v5091_v4, %v3831_v3  ;;  %v3799_v17 = vld [vmem:[%s7825_s5 + $0xc8] sm:$0xf]  ;;  %v4185_v48 = vld [vmem:[%s7825_s5 + $0x3e8] sm:$0xf0] }
  0xe9   :  { %2352 = vmatpush.bf16.msra.mxu1 %v4532_v47  ;;  %2338 = vmatpush.bf16.msra.mxu0 %v4276_v56  ;;  %v3735_v49 = vld [vmem:[%s7825_s5 + $0x48] sm:$0xf]  ;;  %v5111_v3 = vld [vmem:[%s7825_s5 + $0x1cc] sm:$0xf] }
  0xea   :  { %v3929_v4 = vld [vmem:[%s7825_s5 + $0x1e8] sm:$0xf0] }
  0xec   :  { %2325 = vmatpush.bf16.msrb.mxu3 %v3988_v15  ;;  %2311 = vmatpush.bf16.msrb.mxu2 %v3732_v32  ;;  %v3927_v32 = vld [vmem:[%s7825_s5 + $0x1c8] sm:$0xf] }
  0xed   :  { %2353 = vmatpush.bf16.msra.mxu1 %v4500_v53  ;;  %2339 = vmatpush.bf16.msra.mxu0 %v4244_v2  ;;  %v3928_v39 = vor.u32 %v5115_v33, %v3927_v32  ;;  %v3767_v33 = vld [vmem:[%s7825_s5 + $0x88] sm:$0xf] }
  0xf0   :  { %2326 = vmatpush.bf16.msrb.mxu3 %v3956_v27  ;;  %2312 = vmatpush.bf16.msrb.mxu2 %v3700_v42  ;;  %v5171_v27 = vld [vmem:[%s7825_s5 + $0x3a4] sm:$0xf0] }
  0xf1   :  { %2354 = vmatpush.bf16.msra.mxu1 %v4468_v60  ;;  %2340 = vmatpush.bf16.msra.mxu0 %v4212_v6  ;;  %v4152_v34 = vor.u32 %v5171_v27, %v4151_v26  ;;  %v3895_v42 = vld [vmem:[%s7825_s5 + $0x188] sm:$0xf] }
  0xf2   :  { %v3896_v51 = vor.u32 %v5107_v43, %v3895_v42  ;;  %v5131_v26 = vld [vmem:[%s7825_s5 + $0x264] sm:$0xf0] }
  0xf3   :  { %v5123_v42 = vld [vmem:[%s7825_s5 + $0x224] sm:$0xf0] }
  0xf4   :  { %v4599_v43 = vld [vmem:[%s7825_s5 + $0x708] sm:$0xf] }
 0x12f   :  { %v608_v61 = vpop.f32.mrf.mxu0 }
 0x130   :  { %v622_v1 = vpop.f32.mrf.mxu1  ;;  %v609_v5 = vadd.f32 %v608_v61, %v244_v0  ;;  %v5147_v61 = vld [vmem:[%s7825_s5 + $0x2e4] sm:$0xf0] }
 0x131   :  { %v4056_v6 = vor.u32 %v5147_v61, %v4055_v58  ;;  %v4153_v61 = vld [vmem:[%s7825_s5 + $0x3a8] sm:$0xf0] }
 0x132   :  { %v623_v11 = vadd.f32 %v622_v1, %v609_v5 }
 0x134   :  { %v684_v18 = vmax.f32 %v623_v11, 0.0 }
 0x135   :  { %v580_v7 = vpop.f32.mrf.mxu2 }
 0x136   :  { %v594_v9 = vpop.f32.mrf.mxu3  ;;  %v581_v14 = vadd.f32 %v580_v7, %v243_v8  ;;  %v4696_v7 = vor.u32 %v5307_v63, %v4695_v62  ;;  %v3703_v62 = vld [vmem:[%s7825_s5 + $0x8] sm:$0xf] }
 0x137   :  { %v610_v10 = vpop.f32.mrf.mxu0  ;;  %v5059_v63 = vld [vmem:[%s7825_s5 + $0x24] sm:$0xf0] }
 0x138   :  { %v611_v12 = vadd.f32 %v610_v10, %v244_v0  ;;  %v624_v13 = vpop.f32.mrf.mxu1  ;;  %v595_v22 = vadd.f32 %v594_v9, %v581_v14  ;;  %v3864_v0 = vor.u32 %v5099_v55, %v3863_v54  ;;  %v5299_v14 = vld [vmem:[%s7825_s5 + $0x7a4] sm:$0xf0] }
 0x13a   :  { %v625_v15 = vadd.f32 %v624_v13, %v611_v12  ;;  %v683_v35 = vmax.f32 %v595_v22, 0.0  ;;  %v5139_v12 = vld [vmem:[%s7825_s5 + $0x2a4] sm:$0xf0] }
 0x13b   :  { %v4663_v13 = vld [vmem:[%s7825_s5 + $0x788] sm:$0xf] }
 0x13c   :  { %v688_v19 = vmax.f32 %v625_v15, 0.0 }
 0x13d   :  { %v582_v20 = vpop.f32.mrf.mxu2 }
 0x13e   :  { %v6352_v23 = vpack.c.bf16 %v688_v19, %v684_v18  ;;  %v583_v24 = vadd.f32 %v582_v20, %v243_v8  ;;  %v596_v25 = vpop.f32.mrf.mxu3  ;;  %v4023_v8 = vld [vmem:[%s7825_s5 + $0x288] sm:$0xf] }
 0x13f   :  { %v664_v28 = vpop.f32.mrf.mxu0  ;;  %v5083_v19 = vld [vmem:[%s7825_s5 + $0xe4] sm:$0xf0]  ;;  %v4024_v22 = vor.u32 %v5139_v12, %v4023_v8  ;;  %v3704_v8 = vor.u32 %v5059_v63, %v3703_v62  ;;  %v4121_v12 = vld [vmem:[%s7825_s5 + $0x368] sm:$0xf0] }
 0x140   :  { %v597_v29 = vadd.f32 %v596_v25, %v583_v24  ;;  %v678_v31 = vpop.f32.mrf.mxu1  ;;  %2271 = vmatmul.bf16.vlgmr.msra.gmra.mxu3 %v6352_v23  ;;  %v665_v41 = vadd.f32 %v664_v28, %v246_v30  ;;  %v4439_v20 = vld [vmem:[%s7825_s5 + $0x5c8] sm:$0xf]  ;;  %v4664_v24 = vor.u32 %v5299_v14, %v4663_v13  ;;  %v3932_v13 = vor.u32 %v5111_v3, %v3929_v4  ;;  %v5287_v3 = vld [vmem:[%s7825_s5 + $0x74c] sm:$0xf] }
 0x141   :  { %2375 = vmatpush.bf16.msra.mxu3 %v4184_v21  ;;  %v5243_v21 = vld [vmem:[%s7825_s5 + $0x5e4] sm:$0xf0]  ;;  %v4633_v4 = vld [vmem:[%s7825_s5 + $0x768] sm:$0xf0] }
 0x142   :  { %v687_v36 = vmax.f32 %v597_v29, 0.0  ;;  %v679_v52 = vadd.f32 %v678_v31, %v665_v41  ;;  %v3991_v25 = vld [vmem:[%s7825_s5 + $0x248] sm:$0xf]  ;;  %v3800_v31 = vor.u32 %v5083_v19, %v3799_v17  ;;  %v4440_v32 = vor.u32 %v5243_v21, %v4439_v20  ;;  %v5103_v17 = vld [vmem:[%s7825_s5 + $0x18c] sm:$0xf] }
 0x143   :  { %v4631_v29 = vld [vmem:[%s7825_s5 + $0x748] sm:$0xf]  ;;  %v3992_v38 = vor.u32 %v5131_v26, %v3991_v25  ;;  %v4089_v25 = vld [vmem:[%s7825_s5 + $0x328] sm:$0xf0] }
 0x144   :  { %v6374_v40 = vpack.c.bf16 %v687_v36, %v683_v35  ;;  %v686_v1 = vmax.f32 %v679_v52, 0.0  ;;  %v5075_v35 = vld [vmem:[%s7825_s5 + $0xa4] sm:$0xf0] }
 0x145   :  { %2376 = vmatpush.bf16.msra.mxu3 %v4152_v34  ;;  %v636_v44 = vpop.f32.mrf.mxu2  ;;  %v4407_v36 = vld [vmem:[%s7825_s5 + $0x588] sm:$0xf] }
 0x146   :  { %v650_v47 = vpop.f32.mrf.mxu3  ;;  %2257 = vmatmul.bf16.vlgmr.msra.gmra.mxu2 %v6374_v40  ;;  %v637_v59 = vadd.f32 %v636_v44, %v245_v46  ;;  %v3959_v41 = vld [vmem:[%s7825_s5 + $0x208] sm:$0xf] }
 0x147   :  { %2361 = vmatpush.bf16.msra.mxu2 %v3928_v39  ;;  %v666_v50 = vpop.f32.mrf.mxu0  ;;  %v5283_v44 = vld [vmem:[%s7825_s5 + $0x724] sm:$0xf0] }
 0x148   :  { %v667_v53 = vadd.f32 %v666_v50, %v246_v30  ;;  %v680_v56 = vpop.f32.mrf.mxu1  ;;  %v651_v9 = vadd.f32 %v650_v47, %v637_v59  ;;  %v5291_v30 = vld [vmem:[%s7825_s5 + $0x764] sm:$0xf0]  ;;  %v5175_v47 = vld [vmem:[%s7825_s5 + $0x3cc] sm:$0xf]  ;;  %v4600_v54 = vor.u32 %v5283_v44, %v4599_v43 }
 0x149   :  { %2377 = vmatpush.bf16.msra.mxu3 %v4120_v45  ;;  %v4632_v39 = vor.u32 %v5291_v30, %v4631_v29  ;;  %v3768_v45 = vor.u32 %v5075_v35, %v3767_v33  ;;  %v5067_v50 = vld [vmem:[%s7825_s5 + $0x64] sm:$0xf0]  ;;  %v4188_v55 = vor.u32 %v5175_v47, %v4185_v48  ;;  %v5095_v30 = vld [vmem:[%s7825_s5 + $0x14c] sm:$0xf] }
 0x14a   :  { %v681_v60 = vadd.f32 %v680_v56, %v667_v53  ;;  %v685_v27 = vmax.f32 %v651_v9, 0.0  ;;  %v5227_v52 = vld [vmem:[%s7825_s5 + $0x564] sm:$0xf0]  ;;  %v3960_v53 = vor.u32 %v5123_v42, %v3959_v41  ;;  %v3736_v58 = vor.u32 %v5067_v50, %v3735_v49  ;;  %v4697_v41 = vld [vmem:[%s7825_s5 + $0x7e8] sm:$0xf0] }
 0x14b   :  { %2362 = vmatpush.bf16.msra.mxu2 %v3896_v51  ;;  %v4375_v51 = vld [vmem:[%s7825_s5 + $0x548] sm:$0xf]  ;;  %v3833_v47 = vld [vmem:[%s7825_s5 + $0x128] sm:$0xf0] }
 0x14c   :  { %v690_v2 = vmax.f32 %v681_v60, 0.0  ;;  %v4567_v56 = vld [vmem:[%s7825_s5 + $0x6c8] sm:$0xf]  ;;  %v4376_v59 = vor.u32 %v5227_v52, %v4375_v51  ;;  %v5167_v60 = vld [vmem:[%s7825_s5 + $0x38c] sm:$0xf] }
 0x14d   :  { %2378 = vmatpush.bf16.msra.mxu3 %v4088_v57  ;;  %v638_v5 = vpop.f32.mrf.mxu2  ;;  %v5275_v57 = vld [vmem:[%s7825_s5 + $0x6e4] sm:$0xf0]  ;;  %v5135_v50 = vld [vmem:[%s7825_s5 + $0x28c] sm:$0xf] }
 0x14e   :  { %v6417_v10 = vpack.c.bf16 %v690_v2, %v686_v1  ;;  %v639_v11 = vadd.f32 %v638_v5, %v245_v46  ;;  %v652_v15 = vpop.f32.mrf.mxu3  ;;  %v4408_v46 = vor.u32 %v5235_v37, %v4407_v36  ;;  %v5219_v1 = vld [vmem:[%s7825_s5 + $0x524] sm:$0xf0]  ;;  %v4568_v2 = vor.u32 %v5275_v57, %v4567_v56  ;;  %v5143_v36 = vld [vmem:[%s7825_s5 + $0x2cc] sm:$0xf] }
 0x14f   :  { %2363 = vmatpush.bf16.msra.mxu2 %v3864_v0  ;;  %v4343_v0 = vld [vmem:[%s7825_s5 + $0x508] sm:$0xf]  ;;  %v4156_v5 = vor.u32 %v5167_v60, %v4153_v61  ;;  %v4025_v52 = vld [vmem:[%s7825_s5 + $0x2a8] sm:$0xf0] }
 0x150   :  { %v653_v18 = vadd.f32 %v652_v15, %v639_v11  ;;  %2299 = vmatmul.bf16.vlgmr.msrb.gmra.mxu1 %v6417_v10  ;;  %2327 = vmatmul.bf16.vlgmr.msrb.gmra.mxu3 %v6352_v23  ;;  %v4344_v9 = vor.u32 %v5219_v1, %v4343_v0  ;;  %v5159_v11 = vld [vmem:[%s7825_s5 + $0x34c] sm:$0xf]  ;;  %v4311_v14 = vld [vmem:[%s7825_s5 + $0x4c8] sm:$0xf]  ;;  %v4028_v62 = vor.u32 %v5135_v50, %v4025_v52  ;;  %v4127_v50 = vld [vmem:[%s7825_s5 + $0x350] sm:$0xf] }
 0x151   :  { %2379 = vmatpush.bf16.msra.mxu3 %v4056_v6  ;;  %2403 = vmatpush.bf16.msrb.mxu1 %v4696_v7  ;;  %v4535_v6 = vld [vmem:[%s7825_s5 + $0x688] sm:$0xf]  ;;  %v4124_v19 = vor.u32 %v5159_v11, %v4121_v12  ;;  %v5239_v60 = vld [vmem:[%s7825_s5 + $0x5cc] sm:$0xf] }
 0x152   :  { %v689_v28 = vmax.f32 %v653_v18, 0.0  ;;  %v5267_v7 = vld [vmem:[%s7825_s5 + $0x6a4] sm:$0xf0]  ;;  %v3897_v18 = vld [vmem:[%s7825_s5 + $0x1a8] sm:$0xf0] }
 0x153   :  { %2364 = vmatpush.bf16.msra.mxu2 %v3832_v16  ;;  %v5211_v15 = vld [vmem:[%s7825_s5 + $0x4e4] sm:$0xf0]  ;;  %v4536_v16 = vor.u32 %v5267_v7, %v4535_v6  ;;  %v3900_v26 = vor.u32 %v5103_v17, %v3897_v18  ;;  %v4441_v61 = vld [vmem:[%s7825_s5 + $0x5e8] sm:$0xf0] }
 0x154   :  { %v6457_v34 = vpack.c.bf16 %v689_v28, %v685_v27  ;;  %v4503_v20 = vld [vmem:[%s7825_s5 + $0x648] sm:$0xf]  ;;  %v5127_v0 = vld [vmem:[%s7825_s5 + $0x24c] sm:$0xf]  ;;  %v4444_v6 = vor.u32 %v5239_v60, %v4441_v61 }
 0x155   :  { %2380 = vmatpush.bf16.msra.mxu3 %v4024_v22  ;;  %2404 = vmatpush.bf16.msrb.mxu1 %v4664_v24  ;;  %v5259_v21 = vld [vmem:[%s7825_s5 + $0x664] sm:$0xf0]  ;;  %v4312_v22 = vor.u32 %v5211_v15, %v4311_v14  ;;  %v5151_v24 = vld [vmem:[%s7825_s5 + $0x30c] sm:$0xf] }
 0x156   :  { %2285 = vmatmul.bf16.vlgmr.msrb.gmra.mxu0 %v6457_v34  ;;  %2313 = vmatmul.bf16.vlgmr.msrb.gmra.mxu2 %v6374_v40  ;;  %v4279_v27 = vld [vmem:[%s7825_s5 + $0x488] sm:$0xf]  ;;  %v4504_v29 = vor.u32 %v5259_v21, %v4503_v20  ;;  %v5071_v7 = vld [vmem:[%s7825_s5 + $0x8c] sm:$0xf]  ;;  %v4191_v20 = vld [vmem:[%s7825_s5 + $0x3d0] sm:$0xf] }
 0x157   :  { %2365 = vmatpush.bf16.msra.mxu2 %v3800_v31  ;;  %2389 = vmatpush.bf16.msrb.mxu0 %v4440_v32  ;;  %v5203_v28 = vld [vmem:[%s7825_s5 + $0x4a4] sm:$0xf0]  ;;  %v3865_v31 = vld [vmem:[%s7825_s5 + $0x168] sm:$0xf0]  ;;  %v4092_v32 = vor.u32 %v5151_v24, %v4089_v25  ;;  %v5180_v21 = vld [vmem:[%s7825_s5 + $0x3ec] sm:$0xf0] }
 0x158   :  { %v4471_v33 = vld [vmem:[%s7825_s5 + $0x608] sm:$0xf]  ;;  %v4280_v37 = vor.u32 %v5203_v28, %v4279_v27  ;;  %v3868_v42 = vor.u32 %v5095_v30, %v3865_v31  ;;  %v4409_v11 = vld [vmem:[%s7825_s5 + $0x5a8] sm:$0xf0] }
 0x159   :  { %2381 = vmatpush.bf16.msra.mxu3 %v3992_v38  ;;  %2405 = vmatpush.bf16.msrb.mxu1 %v4632_v39  ;;  %v5251_v35 = vld [vmem:[%s7825_s5 + $0x624] sm:$0xf0]  ;;  %v4057_v38 = vld [vmem:[%s7825_s5 + $0x2e8] sm:$0xf0] }
 0x15a   :  { %v5303_v39 = vld [vmem:[%s7825_s5 + $0x7cc] sm:$0xf]  ;;  %v4247_v43 = vld [vmem:[%s7825_s5 + $0x448] sm:$0xf]  ;;  %v4060_v48 = vor.u32 %v5143_v36, %v4057_v38  ;;  %v5172_v36 = vld [vmem:[%s7825_s5 + $0x3ac] sm:$0xf0] }
 0x15b   :  { %2366 = vmatpush.bf16.msra.mxu2 %v3768_v45  ;;  %2390 = vmatpush.bf16.msrb.mxu0 %v4408_v46  ;;  %v5195_v44 = vld [vmem:[%s7825_s5 + $0x464] sm:$0xf0]  ;;  %v4472_v45 = vor.u32 %v5251_v35, %v4471_v33  ;;  %v5087_v46 = vld [vmem:[%s7825_s5 + $0x10c] sm:$0xf]  ;;  %v4700_v49 = vor.u32 %v5303_v39, %v4697_v41  ;;  %v4159_v35 = vld [vmem:[%s7825_s5 + $0x390] sm:$0xf] }
 0x15c   :  { %v4248_v51 = vor.u32 %v5195_v44, %v4247_v43  ;;  %v4215_v56 = vld [vmem:[%s7825_s5 + $0x408] sm:$0xf]  ;;  %v5119_v14 = vld [vmem:[%s7825_s5 + $0x20c] sm:$0xf]  ;;  %v3935_v43 = vld [vmem:[%s7825_s5 + $0x1d0] sm:$0xf] }
 0x15d   :  { %2382 = vmatpush.bf16.msra.mxu3 %v3960_v53  ;;  %2406 = vmatpush.bf16.msrb.mxu1 %v4600_v54  ;;  %v5295_v53 = vld [vmem:[%s7825_s5 + $0x78c] sm:$0xf]  ;;  %v5187_v57 = vld [vmem:[%s7825_s5 + $0x424] sm:$0xf0]  ;;  %v5116_v44 = vld [vmem:[%s7825_s5 + $0x1ec] sm:$0xf0] }
 0x15e   :  { %v4665_v54 = vld [vmem:[%s7825_s5 + $0x7a8] sm:$0xf0]  ;;  %v4216_v1 = vor.u32 %v5187_v57, %v4215_v56  ;;  %v3936_v52 = vor.u32 %v5116_v44, %v3935_v43  ;;  %v3903_v56 = vld [vmem:[%s7825_s5 + $0x190] sm:$0xf] }
 0x15f   :  { %2367 = vmatpush.bf16.msra.mxu2 %v3736_v58  ;;  %2391 = vmatpush.bf16.msrb.mxu0 %v4376_v59  ;;  %v5079_v58 = vld [vmem:[%s7825_s5 + $0xcc] sm:$0xf]  ;;  %v4668_v63 = vor.u32 %v5295_v53, %v4665_v54  ;;  %v5108_v57 = vld [vmem:[%s7825_s5 + $0x1ac] sm:$0xf0] }
 0x160   :  { %2355 = vmatmul.bf16.vlgmr.msra.gmra.mxu1 %v6417_v10  ;;  %2383 = vmatmul.bf16.vlgmr.msra.gmra.mxu3 %v6352_v23  ;;  %v3801_v59 = vld [vmem:[%s7825_s5 + $0xe8] sm:$0xf0] }
 0x161   :  { %2431 = vmatpush.bf16.msrb.mxu3 %v4188_v55  ;;  %2407 = vmatpush.bf16.msrb.mxu1 %v4568_v2  ;;  %v3836_v55 = vor.u32 %v5087_v46, %v3833_v47  ;;  %v3993_v2 = vld [vmem:[%s7825_s5 + $0x268] sm:$0xf0] }
 0x162   :  { %v3996_v12 = vor.u32 %v5127_v0, %v3993_v2  ;;  %v3961_v15 = vld [vmem:[%s7825_s5 + $0x228] sm:$0xf0]  ;;  %v3904_v0 = vor.u32 %v5108_v57, %v3903_v56  ;;  %v5284_v56 = vld [vmem:[%s7825_s5 + $0x72c] sm:$0xf0] }
 0x163   :  { %2368 = vmatpush.bf16.msra.mxu2 %v3704_v8  ;;  %2392 = vmatpush.bf16.msrb.mxu0 %v4344_v9  ;;  %v3769_v8 = vld [vmem:[%s7825_s5 + $0xa8] sm:$0xf0]  ;;  %v3964_v27 = vor.u32 %v5119_v14, %v3961_v15  ;;  %v5308_v14 = vld [vmem:[%s7825_s5 + $0x7ec] sm:$0xf0] }
 0x164   :  { %v5231_v9 = vld [vmem:[%s7825_s5 + $0x58c] sm:$0xf]  ;;  %v3772_v18 = vor.u32 %v5071_v7, %v3769_v8 }
 0x165   :  { %2432 = vmatpush.bf16.msrb.mxu3 %v4156_v5  ;;  %2408 = vmatpush.bf16.msrb.mxu1 %v4536_v16  ;;  %v3804_v5 = vor.u32 %v5079_v58, %v3801_v59  ;;  %v5279_v16 = vld [vmem:[%s7825_s5 + $0x70c] sm:$0xf] }
 0x166   :  { %2341 = vmatmul.bf16.vlgmr.msra.gmra.mxu0 %v6457_v34  ;;  %2369 = vmatmul.bf16.vlgmr.msra.gmra.mxu2 %v6374_v40  ;;  %v4601_v17 = vld [vmem:[%s7825_s5 + $0x728] sm:$0xf0] }
 0x167   :  { %2417 = vmatpush.bf16.msrb.mxu2 %v3932_v13  ;;  %2393 = vmatpush.bf16.msrb.mxu0 %v4312_v22  ;;  %v4636_v13 = vor.u32 %v5287_v3, %v4633_v4  ;;  %v5063_v22 = vld [vmem:[%s7825_s5 + $0x4c] sm:$0xf]  ;;  %v4604_v28 = vor.u32 %v5279_v16, %v4601_v17  ;;  %v3871_v4 = vld [vmem:[%s7825_s5 + $0x150] sm:$0xf] }
 0x168   :  { %v3737_v24 = vld [vmem:[%s7825_s5 + $0x68] sm:$0xf0] }
 0x169   :  { %2433 = vmatpush.bf16.msrb.mxu3 %v4124_v19  ;;  %2409 = vmatpush.bf16.msrb.mxu1 %v4504_v29  ;;  %v4412_v19 = vor.u32 %v5231_v9, %v4409_v11  ;;  %v5223_v25 = vld [vmem:[%s7825_s5 + $0x54c] sm:$0xf]  ;;  %v4192_v29 = vor.u32 %v5180_v21, %v4191_v20  ;;  %v4063_v9 = vld [vmem:[%s7825_s5 + $0x2d0] sm:$0xf] }
 0x16a   :  { %v5271_v30 = vld [vmem:[%s7825_s5 + $0x6cc] sm:$0xf]  ;;  %v5092_v20 = vld [vmem:[%s7825_s5 + $0x12c] sm:$0xf0] }
 0x16b   :  { %2418 = vmatpush.bf16.msrb.mxu2 %v3900_v26  ;;  %2394 = vmatpush.bf16.msrb.mxu0 %v4280_v37  ;;  %v4377_v26 = vld [vmem:[%s7825_s5 + $0x568] sm:$0xf0] }
 0x16c   :  { %v4569_v31 = vld [vmem:[%s7825_s5 + $0x6e8] sm:$0xf0]  ;;  %v4380_v33 = vor.u32 %v5223_v25, %v4377_v26  ;;  %v5140_v26 = vld [vmem:[%s7825_s5 + $0x2ac] sm:$0xf0] }
 0x16d   :  { %2434 = vmatpush.bf16.msrb.mxu3 %v4092_v32  ;;  %2410 = vmatpush.bf16.msrb.mxu1 %v4472_v45  ;;  %v3740_v32 = vor.u32 %v5063_v22, %v3737_v24  ;;  %v5055_v37 = vld [vmem:[%s7825_s5 + $0xc] sm:$0xf]  ;;  %v4160_v45 = vor.u32 %v5172_v36, %v4159_v35  ;;  %v4031_v24 = vld [vmem:[%s7825_s5 + $0x290] sm:$0xf] }
 0x16e   :  { %v3705_v38 = vld [vmem:[%s7825_s5 + $0x28] sm:$0xf0]  ;;  %v4447_v35 = vld [vmem:[%s7825_s5 + $0x5d0] sm:$0xf] }
 0x16f   :  { %2419 = vmatpush.bf16.msrb.mxu2 %v3868_v42  ;;  %2395 = vmatpush.bf16.msrb.mxu0 %v4248_v51  ;;  %v5215_v39 = vld [vmem:[%s7825_s5 + $0x50c] sm:$0xf]  ;;  %v4572_v42 = vor.u32 %v5271_v30, %v4569_v31  ;;  %v5164_v51 = vld [vmem:[%s7825_s5 + $0x36c] sm:$0xf0] }
 0x170   :  { %2411 = vmatmul.bf16.vlgmr.msrb.gmra.mxu1 %v6417_v10  ;;  %v4345_v41 = vld [vmem:[%s7825_s5 + $0x528] sm:$0xf0]  ;;  %v4128_v58 = vor.u32 %v5164_v51, %v4127_v50  ;;  %v5244_v36 = vld [vmem:[%s7825_s5 + $0x5ec] sm:$0xf0] }
 0x171   :  { %2435 = vmatpush.bf16.msrb.mxu3 %v4060_v48  ;;  %2459 = vmatpush.bf16.msra.mxu1 %v4700_v49  ;;  %v5263_v46 = vld [vmem:[%s7825_s5 + $0x68c] sm:$0xf]  ;;  %v3708_v48 = vor.u32 %v5055_v37, %v3705_v38  ;;  %v4348_v49 = vor.u32 %v5215_v39, %v4345_v41  ;;  %v4032_v37 = vor.u32 %v5140_v26, %v4031_v24  ;;  %v3999_v41 = vld [vmem:[%s7825_s5 + $0x250] sm:$0xf]  ;;  %v5160_v24 = vld [vmem:[%s7825_s5 + $0x354] sm:$0xf] }
 0x172   :  { %v4537_v47 = vld [vmem:[%s7825_s5 + $0x6a8] sm:$0xf0]  ;;  %v4448_v44 = vor.u32 %v5244_v36, %v4447_v35  ;;  %v5236_v50 = vld [vmem:[%s7825_s5 + $0x5ac] sm:$0xf0]  ;;  %v4129_v26 = vld [vmem:[%s7825_s5 + $0x370] sm:$0xf0] }
 0x173   :  { %2420 = vmatpush.bf16.msrb.mxu2 %v3836_v55  ;;  %2396 = vmatpush.bf16.msrb.mxu0 %v4216_v1  ;;  %v5207_v53 = vld [vmem:[%s7825_s5 + $0x4cc] sm:$0xf]  ;;  %v4540_v55 = vor.u32 %v5263_v46, %v4537_v47  ;;  %v5292_v46 = vld [vmem:[%s7825_s5 + $0x76c] sm:$0xf0] }
 0x174   :  { %v4313_v54 = vld [vmem:[%s7825_s5 + $0x4e8] sm:$0xf0]  ;;  %v3775_v47 = vld [vmem:[%s7825_s5 + $0x90] sm:$0xf] }
 0x175   :  { %2436 = vmatpush.bf16.msrb.mxu3 %v4028_v62  ;;  %2460 = vmatpush.bf16.msra.mxu1 %v4668_v63  ;;  %v5255_v59 = vld [vmem:[%s7825_s5 + $0x64c] sm:$0xf]  ;;  %v4316_v61 = vor.u32 %v5207_v53, %v4313_v54  ;;  %v4095_v62 = vld [vmem:[%s7825_s5 + $0x310] sm:$0xf] }
 0x176   :  { %2397 = vmatmul.bf16.vlgmr.msrb.gmra.mxu0 %v6457_v34  ;;  %v4505_v60 = vld [vmem:[%s7825_s5 + $0x668] sm:$0xf0]  ;;  %v5156_v63 = vld [vmem:[%s7825_s5 + $0x32c] sm:$0xf0] }
 0x177   :  { %2421 = vmatpush.bf16.msrb.mxu2 %v3804_v5  ;;  %2445 = vmatpush.bf16.msra.mxu0 %v4444_v6  ;;  %v5199_v1 = vld [vmem:[%s7825_s5 + $0x48c] sm:$0xf]  ;;  %v4508_v3 = vor.u32 %v5255_v59, %v4505_v60  ;;  %v5100_v5 = vld [vmem:[%s7825_s5 + $0x16c] sm:$0xf0]  ;;  %v4096_v6 = vor.u32 %v5156_v63, %v4095_v62  ;;  %v5176_v59 = vld [vmem:[%s7825_s5 + $0x3d4] sm:$0xf] }
 0x178   :  { %v4281_v2 = vld [vmem:[%s7825_s5 + $0x4a8] sm:$0xf0]  ;;  %v3872_v15 = vor.u32 %v5100_v5, %v3871_v4  ;;  %v5124_v54 = vld [vmem:[%s7825_s5 + $0x22c] sm:$0xf0]  ;;  %v4193_v60 = vld [vmem:[%s7825_s5 + $0x3f0] sm:$0xf0] }
 0x179   :  { %2437 = vmatpush.bf16.msrb.mxu3 %v3996_v12  ;;  %2461 = vmatpush.bf16.msra.mxu1 %v4636_v13  ;;  %v5247_v7 = vld [vmem:[%s7825_s5 + $0x60c] sm:$0xf]  ;;  %v4284_v11 = vor.u32 %v5199_v1, %v4281_v2  ;;  %v5148_v12 = vld [vmem:[%s7825_s5 + $0x2ec] sm:$0xf0] }
 0x17a   :  { %v4473_v8 = vld [vmem:[%s7825_s5 + $0x628] sm:$0xf0]  ;;  %v4703_v13 = vld [vmem:[%s7825_s5 + $0x7d0] sm:$0xf]  ;;  %v4064_v21 = vor.u32 %v5148_v12, %v4063_v9  ;;  %v4161_v9 = vld [vmem:[%s7825_s5 + $0x3b0] sm:$0xf0] }
 0x17b   :  { %2422 = vmatpush.bf16.msrb.mxu2 %v3772_v18  ;;  %2446 = vmatpush.bf16.msra.mxu0 %v4412_v19  ;;  %v5191_v16 = vld [vmem:[%s7825_s5 + $0x44c] sm:$0xf]  ;;  %v4476_v18 = vor.u32 %v5247_v7, %v4473_v8  ;;  %v3839_v19 = vld [vmem:[%s7825_s5 + $0x110] sm:$0xf]  ;;  %v4704_v22 = vor.u32 %v5308_v14, %v4703_v13  ;;  %v5168_v8 = vld [vmem:[%s7825_s5 + $0x394] sm:$0xf] }
 0x17c   :  { %v4249_v17 = vld [vmem:[%s7825_s5 + $0x468] sm:$0xf0]  ;;  %v5068_v62 = vld [vmem:[%s7825_s5 + $0x6c] sm:$0xf0] }
 0x17d   :  { %2438 = vmatpush.bf16.msrb.mxu3 %v3964_v27  ;;  %2462 = vmatpush.bf16.msra.mxu1 %v4604_v28  ;;  %v4252_v25 = vor.u32 %v5191_v16, %v4249_v17  ;;  %v4671_v27 = vld [vmem:[%s7825_s5 + $0x790] sm:$0xf]  ;;  %v5183_v30 = vld [vmem:[%s7825_s5 + $0x40c] sm:$0xf]  ;;  %v3937_v16 = vld [vmem:[%s7825_s5 + $0x1f0] sm:$0xf0] }
 0x17e   :  { %v5300_v28 = vld [vmem:[%s7825_s5 + $0x7ac] sm:$0xf0]  ;;  %v4217_v31 = vld [vmem:[%s7825_s5 + $0x428] sm:$0xf0] }
 0x17f   :  { %2423 = vmatpush.bf16.msrb.mxu2 %v3740_v32  ;;  %2447 = vmatpush.bf16.msra.mxu0 %v4380_v33  ;;  %v3807_v32 = vld [vmem:[%s7825_s5 + $0xd0] sm:$0xf]  ;;  %v4672_v38 = vor.u32 %v5300_v28, %v4671_v27  ;;  %v4220_v39 = vor.u32 %v5183_v30, %v4217_v31  ;;  %v3905_v30 = vld [vmem:[%s7825_s5 + $0x1b0] sm:$0xf0] }
 0x180   :  { %2439 = vmatmul.bf16.vlgmr.msrb.gmra.mxu3 %v6352_v23  ;;  %v5084_v33 = vld [vmem:[%s7825_s5 + $0xec] sm:$0xf0] }
 0x181   :  { %2487 = vmatpush.bf16.msra.mxu3 %v4192_v29  ;;  %2463 = vmatpush.bf16.msra.mxu1 %v4572_v42  ;;  %v3840_v29 = vor.u32 %v5092_v20, %v3839_v19  ;;  %v5132_v42 = vld [vmem:[%s7825_s5 + $0x26c] sm:$0xf0]  ;;  %v3808_v43 = vor.u32 %v5084_v33, %v3807_v32  ;;  %v4132_v32 = vor.u32 %v5160_v24, %v4129_v26  ;;  %v4417_v24 = vld [vmem:[%s7825_s5 + $0x5b0] sm:$0xf0] }
 0x182   :  { %v4000_v51 = vor.u32 %v5132_v42, %v3999_v41  ;;  %v4383_v63 = vld [vmem:[%s7825_s5 + $0x550] sm:$0xf]  ;;  %v5120_v26 = vld [vmem:[%s7825_s5 + $0x214] sm:$0xf] }
 0x183   :  { %2424 = vmatpush.bf16.msrb.mxu2 %v3708_v48  ;;  %2448 = vmatpush.bf16.msra.mxu0 %v4348_v49  ;;  %v5076_v48 = vld [vmem:[%s7825_s5 + $0xac] sm:$0xf0] }
 0x184   :  { %v4415_v49 = vld [vmem:[%s7825_s5 + $0x590] sm:$0xf]  ;;  %v3776_v57 = vor.u32 %v5076_v48, %v3775_v47 }
 0x185   :  { %2488 = vmatpush.bf16.msra.mxu3 %v4160_v45  ;;  %2464 = vmatpush.bf16.msra.mxu1 %v4540_v55  ;;  %v4639_v45 = vld [vmem:[%s7825_s5 + $0x750] sm:$0xf] }
 0x186   :  { %2425 = vmatmul.bf16.vlgmr.msrb.gmra.mxu2 %v6374_v40  ;;  %v4640_v53 = vor.u32 %v5292_v46, %v4639_v45  ;;  %v4607_v55 = vld [vmem:[%s7825_s5 + $0x710] sm:$0xf] }
 0x187   :  { %2473 = vmatpush.bf16.msra.mxu2 %v3936_v52  ;;  %2449 = vmatpush.bf16.msra.mxu0 %v4316_v61  ;;  %v3967_v52 = vld [vmem:[%s7825_s5 + $0x210] sm:$0xf]  ;;  %v4608_v2 = vor.u32 %v5284_v56, %v4607_v55 }
 0x188   :  { %v3743_v61 = vld [vmem:[%s7825_s5 + $0x50] sm:$0xf]  ;;  %v3968_v1 = vor.u32 %v5124_v54, %v3967_v52  ;;  %v4705_v54 = vld [vmem:[%s7825_s5 + $0x7f0] sm:$0xf0] }
 0x189   :  { %2489 = vmatpush.bf16.msra.mxu3 %v4128_v58  ;;  %2465 = vmatpush.bf16.msra.mxu1 %v4508_v3  ;;  %v4416_v58 = vor.u32 %v5236_v50, %v4415_v49  ;;  %v4196_v3 = vor.u32 %v5176_v59, %v4193_v60  ;;  %v4575_v4 = vld [vmem:[%s7825_s5 + $0x6d0] sm:$0xf]  ;;  %v5144_v50 = vld [vmem:[%s7825_s5 + $0x2d4] sm:$0xf] }
 0x18a   :  { %v5276_v5 = vld [vmem:[%s7825_s5 + $0x6ec] sm:$0xf0] }
 0x18b   :  { %2474 = vmatpush.bf16.msra.mxu2 %v3904_v0  ;;  %2450 = vmatpush.bf16.msra.mxu0 %v4284_v11  ;;  %v5228_v0 = vld [vmem:[%s7825_s5 + $0x56c] sm:$0xf0]  ;;  %v4576_v17 = vor.u32 %v5276_v5, %v4575_v4 }
 0x18c   :  { %v4384_v7 = vor.u32 %v5228_v0, %v4383_v63  ;;  %v3711_v11 = vld [vmem:[%s7825_s5 + $0x10] sm:$0xf]  ;;  %v4033_v63 = vld [vmem:[%s7825_s5 + $0x2b0] sm:$0xf0] }
 0x18d   :  { %2490 = vmatpush.bf16.msra.mxu3 %v4096_v6  ;;  %2466 = vmatpush.bf16.msra.mxu1 %v4476_v18  ;;  %v3744_v6 = vor.u32 %v5068_v62, %v3743_v61  ;;  %v5060_v12 = vld [vmem:[%s7825_s5 + $0x2c] sm:$0xf0]  ;;  %v4164_v18 = vor.u32 %v5168_v8, %v4161_v9  ;;  %v5136_v62 = vld [vmem:[%s7825_s5 + $0x294] sm:$0xf] }
 0x18e   :  { %v4351_v13 = vld [vmem:[%s7825_s5 + $0x510] sm:$0xf]  ;;  %v3712_v19 = vor.u32 %v5060_v12, %v3711_v11  ;;  %v5240_v8 = vld [vmem:[%s7825_s5 + $0x5d4] sm:$0xf]  ;;  %v4036_v11 = vor.u32 %v5136_v62, %v4033_v63  ;;  %v4135_v62 = vld [vmem:[%s7825_s5 + $0x358] sm:$0xf] }
 0x18f   :  { %2475 = vmatpush.bf16.msra.mxu2 %v3872_v15  ;;  %2451 = vmatpush.bf16.msra.mxu0 %v4252_v25  ;;  %v5220_v14 = vld [vmem:[%s7825_s5 + $0x52c] sm:$0xf0]  ;;  %v5112_v15 = vld [vmem:[%s7825_s5 + $0x1d4] sm:$0xf] }
 0x190   :  { %2467 = vmatmul.bf16.vlgmr.msra.gmra.mxu1 %v6417_v10  ;;  %v4352_v20 = vor.u32 %v5220_v14, %v4351_v13  ;;  %v3940_v25 = vor.u32 %v5112_v15, %v3937_v16  ;;  %v4319_v27 = vld [vmem:[%s7825_s5 + $0x4d0] sm:$0xf]  ;;  %v4449_v9 = vld [vmem:[%s7825_s5 + $0x5f0] sm:$0xf0] }
 0x191   :  { %2491 = vmatpush.bf16.msra.mxu3 %v4064_v21  ;;  %2515 = vmatpush.bf16.msrb.mxu1 %v4704_v22  ;;  %v4543_v21 = vld [vmem:[%s7825_s5 + $0x690] sm:$0xf]  ;;  %v5128_v15 = vld [vmem:[%s7825_s5 + $0x254] sm:$0xf] }
 0x192   :  { %v5268_v22 = vld [vmem:[%s7825_s5 + $0x6ac] sm:$0xf0]  ;;  %v4001_v16 = vld [vmem:[%s7825_s5 + $0x270] sm:$0xf0] }
 0x193   :  { %2476 = vmatpush.bf16.msra.mxu2 %v3840_v29  ;;  %2452 = vmatpush.bf16.msra.mxu0 %v4220_v39  ;;  %v5212_v28 = vld [vmem:[%s7825_s5 + $0x4ec] sm:$0xf0]  ;;  %v5104_v29 = vld [vmem:[%s7825_s5 + $0x194] sm:$0xf]  ;;  %v4544_v31 = vor.u32 %v5268_v22, %v4543_v21 }
 0x194   :  { %v4320_v33 = vor.u32 %v5212_v28, %v4319_v27  ;;  %v4511_v35 = vld [vmem:[%s7825_s5 + $0x650] sm:$0xf]  ;;  %v4097_v39 = vld [vmem:[%s7825_s5 + $0x330] sm:$0xf0] }
 0x195   :  { %2492 = vmatpush.bf16.msra.mxu3 %v4032_v37  ;;  %2516 = vmatpush.bf16.msrb.mxu1 %v4672_v38  ;;  %v5260_v36 = vld [vmem:[%s7825_s5 + $0x66c] sm:$0xf0]  ;;  %v5152_v37 = vld [vmem:[%s7825_s5 + $0x314] sm:$0xf]  ;;  %v3908_v38 = vor.u32 %v5104_v29, %v3905_v30 }
 0x196   :  { %2453 = vmatmul.bf16.vlgmr.msra.gmra.mxu0 %v6457_v34  ;;  %v4287_v41 = vld [vmem:[%s7825_s5 + $0x490] sm:$0xf]  ;;  %v4512_v45 = vor.u32 %v5260_v36, %v4511_v35  ;;  %v4100_v47 = vor.u32 %v5152_v37, %v4097_v39  ;;  %v3777_v21 = vld [vmem:[%s7825_s5 + $0xb0] sm:$0xf0]  ;;  %v5181_v35 = vld [vmem:[%s7825_s5 + $0x3f4] sm:$0xf0] }
 0x197   :  { %2477 = vmatpush.bf16.msra.mxu2 %v3808_v43  ;;  %2501 = vmatpush.bf16.msrb.mxu0 %v4448_v44  ;;  %v5204_v42 = vld [vmem:[%s7825_s5 + $0x4ac] sm:$0xf0]  ;;  %v5096_v43 = vld [vmem:[%s7825_s5 + $0x154] sm:$0xf] }
 0x198   :  { %v3873_v44 = vld [vmem:[%s7825_s5 + $0x170] sm:$0xf0]  ;;  %v4479_v46 = vld [vmem:[%s7825_s5 + $0x610] sm:$0xf]  ;;  %v4288_v48 = vor.u32 %v5204_v42, %v4287_v41 }
 0x199   :  { %2493 = vmatpush.bf16.msra.mxu3 %v4000_v51  ;;  %2517 = vmatpush.bf16.msrb.mxu1 %v4640_v53  ;;  %v5252_v49 = vld [vmem:[%s7825_s5 + $0x62c] sm:$0xf0]  ;;  %v4065_v51 = vld [vmem:[%s7825_s5 + $0x2f0] sm:$0xf0]  ;;  %v3876_v52 = vor.u32 %v5096_v43, %v3873_v44 }
 0x19a   :  { %v5304_v53 = vld [vmem:[%s7825_s5 + $0x7d4] sm:$0xf]  ;;  %v4255_v55 = vld [vmem:[%s7825_s5 + $0x450] sm:$0xf]  ;;  %v4480_v59 = vor.u32 %v5252_v49, %v4479_v46  ;;  %v4068_v60 = vor.u32 %v5144_v50, %v4065_v51  ;;  %v5173_v49 = vld [vmem:[%s7825_s5 + $0x3b4] sm:$0xf0] }
 0x19b   :  { %2478 = vmatpush.bf16.msra.mxu2 %v3776_v57  ;;  %2502 = vmatpush.bf16.msrb.mxu0 %v4416_v58  ;;  %v5196_v56 = vld [vmem:[%s7825_s5 + $0x46c] sm:$0xf0]  ;;  %v5088_v57 = vld [vmem:[%s7825_s5 + $0x114] sm:$0xf]  ;;  %v4708_v61 = vor.u32 %v5304_v53, %v4705_v54  ;;  %v3943_v54 = vld [vmem:[%s7825_s5 + $0x1d8] sm:$0xf] }
 0x19c   :  { %v3841_v58 = vld [vmem:[%s7825_s5 + $0x130] sm:$0xf0]  ;;  %v4256_v0 = vor.u32 %v5196_v56, %v4255_v55  ;;  %v4223_v4 = vld [vmem:[%s7825_s5 + $0x410] sm:$0xf]  ;;  %v5117_v55 = vld [vmem:[%s7825_s5 + $0x1f4] sm:$0xf0] }
 0x19d   :  { %2494 = vmatpush.bf16.msra.mxu3 %v3968_v1  ;;  %2518 = vmatpush.bf16.msrb.mxu1 %v4608_v2  ;;  %v3844_v1 = vor.u32 %v5088_v57, %v3841_v58  ;;  %v5296_v2 = vld [vmem:[%s7825_s5 + $0x794] sm:$0xf]  ;;  %v5188_v5 = vld [vmem:[%s7825_s5 + $0x42c] sm:$0xf0]  ;;  %v3944_v63 = vor.u32 %v5117_v55, %v3943_v54  ;;  %v4007_v54 = vld [vmem:[%s7825_s5 + $0x258] sm:$0xf] }
 0x19e   :  { %v4224_v13 = vor.u32 %v5188_v5, %v4223_v4  ;;  %v5232_v22 = vld [vmem:[%s7825_s5 + $0x594] sm:$0xf]  ;;  %v5109_v4 = vld [vmem:[%s7825_s5 + $0x1b4] sm:$0xf0] }
 0x19f   :  { %2479 = vmatpush.bf16.msra.mxu2 %v3744_v6  ;;  %2503 = vmatpush.bf16.msrb.mxu0 %v4384_v7  ;;  %v5080_v6 = vld [vmem:[%s7825_s5 + $0xd4] sm:$0xf]  ;;  %v5133_v55 = vld [vmem:[%s7825_s5 + $0x274] sm:$0xf0] }
 0x1a0   :  { %2495 = vmatmul.bf16.vlgmr.msra.gmra.mxu3 %v6352_v23  ;;  %v3809_v7 = vld [vmem:[%s7825_s5 + $0xf0] sm:$0xf0] }
 0x1a1   :  { %2543 = vmatpush.bf16.msrb.mxu3 %v4196_v3  ;;  %2519 = vmatpush.bf16.msrb.mxu1 %v4576_v17  ;;  %v4673_v3 = vld [vmem:[%s7825_s5 + $0x7b0] sm:$0xf0]  ;;  %v3812_v14 = vor.u32 %v5080_v6, %v3809_v7 }
 0x1a2   :  { %v4676_v12 = vor.u32 %v5296_v2, %v4673_v3  ;;  %v5288_v17 = vld [vmem:[%s7825_s5 + $0x754] sm:$0xf]  ;;  %v3911_v3 = vld [vmem:[%s7825_s5 + $0x198] sm:$0xf] }
 0x1a3   :  { %2480 = vmatpush.bf16.msra.mxu2 %v3712_v19  ;;  %2504 = vmatpush.bf16.msrb.mxu0 %v4352_v20  ;;  %v4641_v19 = vld [vmem:[%s7825_s5 + $0x770] sm:$0xf0] }
 0x1a4   :  { %v5072_v20 = vld [vmem:[%s7825_s5 + $0x94] sm:$0xf]  ;;  %v4644_v27 = vor.u32 %v5288_v17, %v4641_v19  ;;  %v5101_v17 = vld [vmem:[%s7825_s5 + $0x174] sm:$0xf0] }
 0x1a5   :  { %2544 = vmatpush.bf16.msrb.mxu3 %v4164_v18  ;;  %2520 = vmatpush.bf16.msrb.mxu1 %v4544_v31  ;;  %v4452_v18 = vor.u32 %v5240_v8, %v4449_v9  ;;  %v3780_v28 = vor.u32 %v5072_v20, %v3777_v21  ;;  %v3969_v29 = vld [vmem:[%s7825_s5 + $0x230] sm:$0xf0] }
 0x1a6   :  { %2481 = vmatmul.bf16.vlgmr.msra.gmra.mxu2 %v6374_v40  ;;  %v5280_v30 = vld [vmem:[%s7825_s5 + $0x714] sm:$0xf]  ;;  %v3972_v41 = vor.u32 %v5120_v26, %v3969_v29 }
 0x1a7   :  { %2529 = vmatpush.bf16.msrb.mxu2 %v3940_v25  ;;  %2505 = vmatpush.bf16.msrb.mxu0 %v4320_v33  ;;  %v4004_v25 = vor.u32 %v5128_v15, %v4001_v16  ;;  %v4609_v31 = vld [vmem:[%s7825_s5 + $0x730] sm:$0xf0]  ;;  %v4199_v33 = vld [vmem:[%s7825_s5 + $0x3d8] sm:$0xf] }
 0x1a8   :  { %v5064_v36 = vld [vmem:[%s7825_s5 + $0x54] sm:$0xf]  ;;  %v4612_v42 = vor.u32 %v5280_v30, %v4609_v31  ;;  %v4200_v43 = vor.u32 %v5181_v35, %v4199_v33  ;;  %v3879_v16 = vld [vmem:[%s7825_s5 + $0x158] sm:$0xf] }
 0x1a9   :  { %2545 = vmatpush.bf16.msrb.mxu3 %v4132_v32  ;;  %2521 = vmatpush.bf16.msrb.mxu1 %v4512_v45  ;;  %v4420_v32 = vor.u32 %v5232_v22, %v4417_v24  ;;  %v3745_v37 = vld [vmem:[%s7825_s5 + $0x70] sm:$0xf0]  ;;  %v4071_v24 = vld [vmem:[%s7825_s5 + $0x2d8] sm:$0xf]  ;;  %v3880_v26 = vor.u32 %v5101_v17, %v3879_v16 }
 0x1aa   :  { %v4385_v39 = vld [vmem:[%s7825_s5 + $0x570] sm:$0xf0]  ;;  %v3748_v46 = vor.u32 %v5064_v36, %v3745_v37  ;;  %v3847_v31 = vld [vmem:[%s7825_s5 + $0x118] sm:$0xf] }
 0x1ab   :  { %2530 = vmatpush.bf16.msrb.mxu2 %v3908_v38  ;;  %2506 = vmatpush.bf16.msrb.mxu0 %v4288_v48  ;;  %v5224_v38 = vld [vmem:[%s7825_s5 + $0x554] sm:$0xf]  ;;  %v4167_v48 = vld [vmem:[%s7825_s5 + $0x398] sm:$0xf] }
 0x1ac   :  { %v5272_v44 = vld [vmem:[%s7825_s5 + $0x6d4] sm:$0xf]  ;;  %v4168_v57 = vor.u32 %v5173_v49, %v4167_v48  ;;  %v4039_v37 = vld [vmem:[%s7825_s5 + $0x298] sm:$0xf] }
 0x1ad   :  { %2546 = vmatpush.bf16.msrb.mxu3 %v4100_v47  ;;  %2522 = vmatpush.bf16.msrb.mxu1 %v4480_v59  ;;  %v4577_v45 = vld [vmem:[%s7825_s5 + $0x6f0] sm:$0xf0]  ;;  %v4388_v47 = vor.u32 %v5224_v38, %v4385_v39  ;;  %v5141_v38 = vld [vmem:[%s7825_s5 + $0x2b4] sm:$0xf0] }
 0x1ae   :  { %v5056_v50 = vld [vmem:[%s7825_s5 + $0x14] sm:$0xf]  ;;  %v4580_v56 = vor.u32 %v5272_v44, %v4577_v45  ;;  %v4455_v48 = vld [vmem:[%s7825_s5 + $0x5d8] sm:$0xf] }
 0x1af   :  { %2531 = vmatpush.bf16.msrb.mxu2 %v3876_v52  ;;  %2507 = vmatpush.bf16.msrb.mxu0 %v4256_v0  ;;  %v3713_v51 = vld [vmem:[%s7825_s5 + $0x30] sm:$0xf0]  ;;  %v5165_v0 = vld [vmem:[%s7825_s5 + $0x374] sm:$0xf0] }
 0x1b0   :  { %2523 = vmatmul.bf16.vlgmr.msrb.gmra.mxu1 %v6417_v10  ;;  %v5216_v52 = vld [vmem:[%s7825_s5 + $0x514] sm:$0xf]  ;;  %v3716_v58 = vor.u32 %v5056_v50, %v3713_v51  ;;  %v4136_v6 = vor.u32 %v5165_v0, %v4135_v62  ;;  %v5245_v49 = vld [vmem:[%s7825_s5 + $0x5f4] sm:$0xf0]  ;;  %v4040_v50 = vor.u32 %v5141_v38, %v4039_v37 }
 0x1b1   :  { %2547 = vmatpush.bf16.msrb.mxu3 %v4068_v60  ;;  %2571 = vmatpush.bf16.msra.mxu1 %v4708_v61  ;;  %v4353_v53 = vld [vmem:[%s7825_s5 + $0x530] sm:$0xf0]  ;;  %v5237_v62 = vld [vmem:[%s7825_s5 + $0x5b4] sm:$0xf0] }
 0x1b2   :  { %v4356_v59 = vor.u32 %v5216_v52, %v4353_v53  ;;  %v5264_v60 = vld [vmem:[%s7825_s5 + $0x694] sm:$0xf]  ;;  %v3975_v0 = vld [vmem:[%s7825_s5 + $0x218] sm:$0xf] }
 0x1b3   :  { %2532 = vmatpush.bf16.msrb.mxu2 %v3844_v1  ;;  %2508 = vmatpush.bf16.msrb.mxu0 %v4224_v13  ;;  %v4545_v61 = vld [vmem:[%s7825_s5 + $0x6b0] sm:$0xf0]  ;;  %v5157_v13 = vld [vmem:[%s7825_s5 + $0x334] sm:$0xf0] }
 0x1b4   :  { %v5208_v1 = vld [vmem:[%s7825_s5 + $0x4d4] sm:$0xf]  ;;  %v4548_v5 = vor.u32 %v5264_v60, %v4545_v61  ;;  %v5077_v60 = vld [vmem:[%s7825_s5 + $0xb4] sm:$0xf0] }
 0x1b5   :  { %2548 = vmatpush.bf16.msrb.mxu3 %v4036_v11  ;;  %2572 = vmatpush.bf16.msra.mxu1 %v4676_v12  ;;  %v4321_v2 = vld [vmem:[%s7825_s5 + $0x4f0] sm:$0xf0]  ;;  %v4103_v11 = vld [vmem:[%s7825_s5 + $0x318] sm:$0xf]  ;;  %v3912_v12 = vor.u32 %v5109_v4, %v3911_v3 }
 0x1b6   :  { %2509 = vmatmul.bf16.vlgmr.msrb.gmra.mxu0 %v6457_v34  ;;  %v4324_v7 = vor.u32 %v5208_v1, %v4321_v2  ;;  %v5256_v8 = vld [vmem:[%s7825_s5 + $0x654] sm:$0xf]  ;;  %v4104_v20 = vor.u32 %v5157_v13, %v4103_v11  ;;  %v4423_v61 = vld [vmem:[%s7825_s5 + $0x598] sm:$0xf] }
 0x1b7   :  { %2533 = vmatpush.bf16.msrb.mxu2 %v3812_v14  ;;  %2557 = vmatpush.bf16.msra.mxu0 %v4452_v18  ;;  %v4513_v9 = vld [vmem:[%s7825_s5 + $0x670] sm:$0xf0]  ;;  %v5125_v4 = vld [vmem:[%s7825_s5 + $0x234] sm:$0xf0] }
 0x1b8   :  { %v5200_v14 = vld [vmem:[%s7825_s5 + $0x494] sm:$0xf]  ;;  %v4516_v18 = vor.u32 %v5256_v8, %v4513_v9  ;;  %v5177_v8 = vld [vmem:[%s7825_s5 + $0x3dc] sm:$0xf]  ;;  %v3751_v11 = vld [vmem:[%s7825_s5 + $0x58] sm:$0xf] }
 0x1b9   :  { %2549 = vmatpush.bf16.msrb.mxu3 %v4004_v25  ;;  %2573 = vmatpush.bf16.msra.mxu1 %v4644_v27  ;;  %v4289_v15 = vld [vmem:[%s7825_s5 + $0x4b0] sm:$0xf0]  ;;  %v5149_v25 = vld [vmem:[%s7825_s5 + $0x2f4] sm:$0xf0]  ;;  %v4201_v9 = vld [vmem:[%s7825_s5 + $0x3f8] sm:$0xf0] }
 0x1ba   :  { %v5248_v19 = vld [vmem:[%s7825_s5 + $0x614] sm:$0xf]  ;;  %v4292_v21 = vor.u32 %v5200_v14, %v4289_v15  ;;  %v4711_v27 = vld [vmem:[%s7825_s5 + $0x7d8] sm:$0xf]  ;;  %v4072_v35 = vor.u32 %v5149_v25, %v4071_v24  ;;  %v3976_v15 = vor.u32 %v5125_v4, %v3975_v0  ;;  %v4204_v17 = vor.u32 %v5177_v8, %v4201_v9  ;;  %v4169_v24 = vld [vmem:[%s7825_s5 + $0x3b8] sm:$0xf0] }
 0x1bb   :  { %2534 = vmatpush.bf16.msrb.mxu2 %v3780_v28  ;;  %2558 = vmatpush.bf16.msra.mxu0 %v4420_v32  ;;  %v4481_v22 = vld [vmem:[%s7825_s5 + $0x630] sm:$0xf0]  ;;  %v5309_v28 = vld [vmem:[%s7825_s5 + $0x7f4] sm:$0xf0]  ;;  %v5305_v8 = vld [vmem:[%s7825_s5 + $0x7dc] sm:$0xf] }
 0x1bc   :  { %v5192_v29 = vld [vmem:[%s7825_s5 + $0x454] sm:$0xf]  ;;  %v5093_v32 = vld [vmem:[%s7825_s5 + $0x134] sm:$0xf0]  ;;  %v4484_v33 = vor.u32 %v5248_v19, %v4481_v22  ;;  %v4712_v36 = vor.u32 %v5309_v28, %v4711_v27  ;;  %v5169_v22 = vld [vmem:[%s7825_s5 + $0x39c] sm:$0xf] }
 0x1bd   :  { %2550 = vmatpush.bf16.msrb.mxu3 %v3972_v41  ;;  %2574 = vmatpush.bf16.msra.mxu1 %v4612_v42  ;;  %v4257_v30 = vld [vmem:[%s7825_s5 + $0x470] sm:$0xf0]  ;;  %v3848_v41 = vor.u32 %v5093_v32, %v3847_v31  ;;  %v4679_v42 = vld [vmem:[%s7825_s5 + $0x798] sm:$0xf]  ;;  %v3945_v31 = vld [vmem:[%s7825_s5 + $0x1f8] sm:$0xf0] }
 0x1be   :  { %v4260_v39 = vor.u32 %v5192_v29, %v4257_v30  ;;  %v5184_v44 = vld [vmem:[%s7825_s5 + $0x414] sm:$0xf]  ;;  %v4391_v13 = vld [vmem:[%s7825_s5 + $0x558] sm:$0xf]  ;;  %v5113_v30 = vld [vmem:[%s7825_s5 + $0x1dc] sm:$0xf] }
 0x1bf   :  { %2535 = vmatpush.bf16.msrb.mxu2 %v3748_v46  ;;  %2559 = vmatpush.bf16.msra.mxu0 %v4388_v47  ;;  %v4225_v45 = vld [vmem:[%s7825_s5 + $0x430] sm:$0xf0]  ;;  %v3815_v46 = vld [vmem:[%s7825_s5 + $0xd8] sm:$0xf]  ;;  %v4713_v9 = vld [vmem:[%s7825_s5 + $0x7f8] sm:$0xf0] }
 0x1c0   :  { %2551 = vmatmul.bf16.vlgmr.msrb.gmra.mxu3 %v6352_v23  ;;  %v5085_v47 = vld [vmem:[%s7825_s5 + $0xf4] sm:$0xf0]  ;;  %v4228_v52 = vor.u32 %v5184_v44, %v4225_v45  ;;  %v3948_v44 = vor.u32 %v5113_v30, %v3945_v31  ;;  %v4137_v45 = vld [vmem:[%s7825_s5 + $0x378] sm:$0xf0] }
 0x1c1   :  { %2599 = vmatpush.bf16.msra.mxu3 %v4200_v43  ;;  %2575 = vmatpush.bf16.msra.mxu1 %v4580_v56  ;;  %v5301_v43 = vld [vmem:[%s7825_s5 + $0x7b4] sm:$0xf0]  ;;  %v3816_v53 = vor.u32 %v5085_v47, %v3815_v46  ;;  %v5081_v31 = vld [vmem:[%s7825_s5 + $0xdc] sm:$0xf] }
 0x1c2   :  { %v4680_v51 = vor.u32 %v5301_v43, %v4679_v42  ;;  %v4647_v56 = vld [vmem:[%s7825_s5 + $0x758] sm:$0xf] }
 0x1c3   :  { %2536 = vmatpush.bf16.msrb.mxu2 %v3716_v58  ;;  %2560 = vmatpush.bf16.msra.mxu0 %v4356_v59  ;;  %v5293_v58 = vld [vmem:[%s7825_s5 + $0x774] sm:$0xf0] }
 0x1c4   :  { %v3783_v59 = vld [vmem:[%s7825_s5 + $0x98] sm:$0xf]  ;;  %v4648_v2 = vor.u32 %v5293_v58, %v4647_v56 }
 0x1c5   :  { %2600 = vmatpush.bf16.msra.mxu3 %v4168_v57  ;;  %2576 = vmatpush.bf16.msra.mxu1 %v4548_v5  ;;  %v4456_v57 = vor.u32 %v5245_v49, %v4455_v48  ;;  %v3784_v3 = vor.u32 %v5077_v60, %v3783_v59  ;;  %v4615_v5 = vld [vmem:[%s7825_s5 + $0x718] sm:$0xf]  ;;  %v5105_v48 = vld [vmem:[%s7825_s5 + $0x19c] sm:$0xf] }
 0x1c6   :  { %2537 = vmatmul.bf16.vlgmr.msrb.gmra.mxu2 %v6374_v40  ;;  %v5229_v14 = vld [vmem:[%s7825_s5 + $0x574] sm:$0xf0]  ;;  %v3913_v49 = vld [vmem:[%s7825_s5 + $0x1b8] sm:$0xf0] }
 0x1c7   :  { %2585 = vmatpush.bf16.msra.mxu2 %v3944_v63  ;;  %2561 = vmatpush.bf16.msra.mxu0 %v4324_v7  ;;  %v4008_v63 = vor.u32 %v5133_v55, %v4007_v54  ;;  %v4424_v7 = vor.u32 %v5237_v62, %v4423_v61  ;;  %v5277_v19 = vld [vmem:[%s7825_s5 + $0x6f4] sm:$0xf0]  ;;  %v5153_v55 = vld [vmem:[%s7825_s5 + $0x31c] sm:$0xf]  ;;  %v3916_v56 = vor.u32 %v5105_v48, %v3913_v49 }
 0x1c8   :  { %v3719_v25 = vld [vmem:[%s7825_s5 + $0x18] sm:$0xf]  ;;  %v5097_v60 = vld [vmem:[%s7825_s5 + $0x15c] sm:$0xf] }
 0x1c9   :  { %2601 = vmatpush.bf16.msra.mxu3 %v4136_v6  ;;  %2577 = vmatpush.bf16.msra.mxu1 %v4516_v18  ;;  %v7258_v1 = vpop.f32.mrf.mxu2  ;;  %v5285_v6 = vld [vmem:[%s7825_s5 + $0x734] sm:$0xf0]  ;;  %v3881_v61 = vld [vmem:[%s7825_s5 + $0x178] sm:$0xf0] }
 0x1ca   :  { %v4616_v16 = vor.u32 %v5285_v6, %v4615_v5  ;;  %v4583_v18 = vld [vmem:[%s7825_s5 + $0x6d8] sm:$0xf]  ;;  %v5145_v5 = vld [vmem:[%s7825_s5 + $0x2dc] sm:$0xf] }
 0x1cb   :  { %2586 = vmatpush.bf16.msra.mxu2 %v3912_v12  ;;  %2562 = vmatpush.bf16.msra.mxu0 %v4292_v21  ;;  %v5069_v12 = vld [vmem:[%s7825_s5 + $0x74] sm:$0xf0]  ;;  %v4392_v21 = vor.u32 %v5229_v14, %v4391_v13  ;;  %v4584_v32 = vor.u32 %v5277_v19, %v4583_v18  ;;  %v4073_v6 = vld [vmem:[%s7825_s5 + $0x2f8] sm:$0xf0] }
 0x1cc   :  { %v5061_v27 = vld [vmem:[%s7825_s5 + $0x34] sm:$0xf0]  ;;  %v5089_v14 = vld [vmem:[%s7825_s5 + $0x11c] sm:$0xf]  ;;  %v4076_v19 = vor.u32 %v5145_v5, %v4073_v6 }
 0x1cd   :  { %2602 = vmatpush.bf16.msra.mxu3 %v4104_v20  ;;  %2578 = vmatpush.bf16.msra.mxu1 %v4484_v33  ;;  %v3752_v20 = vor.u32 %v5069_v12, %v3751_v11  ;;  %v4359_v28 = vld [vmem:[%s7825_s5 + $0x518] sm:$0xf]  ;;  %v4172_v33 = vor.u32 %v5169_v22, %v4169_v24  ;;  %v4041_v22 = vld [vmem:[%s7825_s5 + $0x2b8] sm:$0xf0] }
 0x1ce   :  { %v5221_v29 = vld [vmem:[%s7825_s5 + $0x534] sm:$0xf0]  ;;  %v4649_v49 = vld [vmem:[%s7825_s5 + $0x778] sm:$0xf0] }
 0x1cf   :  { %2587 = vmatpush.bf16.msra.mxu2 %v3880_v26  ;;  %2563 = vmatpush.bf16.msra.mxu0 %v4260_v39  ;;  %v7303_v26 = vpop.f32.mrf.mxu3  ;;  %v4360_v37 = vor.u32 %v5221_v29, %v4359_v28  ;;  %v4551_v38 = vld [vmem:[%s7825_s5 + $0x698] sm:$0xf]  ;;  %v4681_v28 = vld [vmem:[%s7825_s5 + $0x7b8] sm:$0xf0] }
 0x1d0   :  { %2579 = vmatmul.bf16.vlgmr.msra.gmra.mxu1 %v6417_v10  ;;  %v5269_v39 = vld [vmem:[%s7825_s5 + $0x6b4] sm:$0xf0]  ;;  %v5225_v5 = vld [vmem:[%s7825_s5 + $0x55c] sm:$0xf] }
 0x1d1   :  { %2603 = vmatpush.bf16.msra.mxu3 %v4072_v35  ;;  %2627 = vmatpush.bf16.msrb.mxu1 %v4712_v36  ;;  %v7320_v35 = vpop.f32.mrf.mxu1  ;;  %v3720_v36 = vor.u32 %v5061_v27, %v3719_v25  ;;  %v7331_v42 = vpop.f32.mrf.mxu2  ;;  %v4327_v46 = vld [vmem:[%s7825_s5 + $0x4d8] sm:$0xf]  ;;  %v5297_v27 = vld [vmem:[%s7825_s5 + $0x79c] sm:$0xf] }
 0x1d2   :  { %v5213_v47 = vld [vmem:[%s7825_s5 + $0x4f4] sm:$0xf0]  ;;  %v4393_v6 = vld [vmem:[%s7825_s5 + $0x578] sm:$0xf0] }
 0x1d3   :  { %2588 = vmatpush.bf16.msra.mxu2 %v3848_v41  ;;  %2564 = vmatpush.bf16.msra.mxu0 %v4228_v52  ;;  %v5161_v41 = vld [vmem:[%s7825_s5 + $0x35c] sm:$0xf]  ;;  %v7333_v43 = vpop.f32.mrf.mxu0  ;;  %v4328_v52 = vor.u32 %v5213_v47, %v4327_v46  ;;  %v5261_v54 = vld [vmem:[%s7825_s5 + $0x674] sm:$0xf0] }
 0x1d4   :  { %v4295_v58 = vld [vmem:[%s7825_s5 + $0x498] sm:$0xf]  ;;  %v4009_v46 = vld [vmem:[%s7825_s5 + $0x278] sm:$0xf0] }
 0x1d5   :  { %2604 = vmatpush.bf16.msra.mxu3 %v4040_v50  ;;  %2628 = vmatpush.bf16.msrb.mxu1 %v4680_v51  ;;  %v4552_v50 = vor.u32 %v5269_v39, %v4551_v38  ;;  %v4140_v51 = vor.u32 %v5161_v41, %v4137_v45  ;;  %v5205_v59 = vld [vmem:[%s7825_s5 + $0x4b4] sm:$0xf0]  ;;  %v4684_v38 = vor.u32 %v5297_v27, %v4681_v28  ;;  %v5129_v45 = vld [vmem:[%s7825_s5 + $0x25c] sm:$0xf] }
 0x1d6   :  { %2565 = vmatmul.bf16.vlgmr.msra.gmra.mxu0 %v6457_v34  ;;  %v4487_v0 = vld [vmem:[%s7825_s5 + $0x618] sm:$0xf]  ;;  %v5289_v47 = vld [vmem:[%s7825_s5 + $0x75c] sm:$0xf] }
 0x1d7   :  { %2589 = vmatpush.bf16.msra.mxu2 %v3816_v53  ;;  %2613 = vmatpush.bf16.msrb.mxu0 %v4456_v57  ;;  %v4519_v53 = vld [vmem:[%s7825_s5 + $0x658] sm:$0xf]  ;;  %v4105_v57 = vld [vmem:[%s7825_s5 + $0x338] sm:$0xf0]  ;;  %v7375_v62 = vpop.f32.mrf.mxu3 }
 0x1d8   :  { %v5253_v4 = vld [vmem:[%s7825_s5 + $0x634] sm:$0xf0] }
 0x1d9   :  { %2605 = vmatpush.bf16.msra.mxu3 %v4008_v63  ;;  %2629 = vmatpush.bf16.msrb.mxu1 %v4648_v2  ;;  %v4520_v63 = vor.u32 %v5261_v54, %v4519_v53  ;;  %v4108_v2 = vor.u32 %v5153_v55, %v4105_v57  ;;  %v4263_v11 = vld [vmem:[%s7825_s5 + $0x458] sm:$0xf]  ;;  %v7399_v12 = vpop.f32.mrf.mxu1  ;;  %v4488_v18 = vor.u32 %v5253_v4, %v4487_v0  ;;  %v4425_v53 = vld [vmem:[%s7825_s5 + $0x5b8] sm:$0xf0] }
 0x1da   :  { %v5197_v13 = vld [vmem:[%s7825_s5 + $0x474] sm:$0xf0]  ;;  %v4012_v55 = vor.u32 %v5129_v45, %v4009_v46  ;;  %v5281_v0 = vld [vmem:[%s7825_s5 + $0x71c] sm:$0xf] }
 0x1db   :  { %2590 = vmatpush.bf16.msra.mxu2 %v3784_v3  ;;  %2614 = vmatpush.bf16.msrb.mxu0 %v4424_v7  ;;  %v4296_v3 = vor.u32 %v5205_v59, %v4295_v58  ;;  %v3884_v7 = vor.u32 %v5097_v60, %v3881_v61  ;;  %v4264_v24 = vor.u32 %v5197_v13, %v4263_v11  ;;  %v4231_v29 = vld [vmem:[%s7825_s5 + $0x418] sm:$0xf]  ;;  %v5121_v60 = vld [vmem:[%s7825_s5 + $0x21c] sm:$0xf] }
 0x1dc   :  { %v5189_v30 = vld [vmem:[%s7825_s5 + $0x434] sm:$0xf0]  ;;  %v4652_v58 = vor.u32 %v5289_v47, %v4649_v49  ;;  %v3977_v61 = vld [vmem:[%s7825_s5 + $0x238] sm:$0xf0]  ;;  %v4396_v13 = vor.u32 %v5225_v5, %v4393_v6  ;;  %v5316_v47 = vld [vmem:[%s7827_s7 + $0x30] sm:$0xff] }
 0x1dd   :  { %2606 = vmatpush.bf16.msra.mxu3 %v3976_v15  ;;  %2630 = vmatpush.bf16.msrb.mxu1 %v4616_v16  ;;  %v3849_v15 = vld [vmem:[%s7825_s5 + $0x138] sm:$0xf0]  ;;  %v7410_v16 = vpop.f32.mrf.mxu2  ;;  %v4232_v41 = vor.u32 %v5189_v30, %v4231_v29 }
 0x1de   :  { %v3852_v25 = vor.u32 %v5089_v14, %v3849_v15  ;;  %v3753_v4 = vld [vmem:[%s7825_s5 + $0x78] sm:$0xf0] }
 0x1df   :  { %2591 = vmatpush.bf16.msra.mxu2 %v3752_v20  ;;  %2615 = vmatpush.bf16.msrb.mxu0 %v4392_v21  ;;  %v4716_v20 = vor.u32 %v5305_v8, %v4713_v9  ;;  %v5137_v21 = vld [vmem:[%s7825_s5 + $0x29c] sm:$0xf]  ;;  %v7444_v39 = vpop.f32.mrf.mxu3 }
 0x1e0   :  { %2607 = vmatmul.bf16.vlgmr.msra.gmra.mxu3 %v6352_v23  ;;  %v5325_v9 = vld [vmem:[%s7827_s7 + $0x78] sm:$0xff] }
 0x1e1   :  { %2655 = vmatpush.bf16.msrb.mxu3 %v4204_v17  ;;  %2631 = vmatpush.bf16.msrb.mxu1 %v4584_v32  ;;  %v7412_v17 = vpop.f32.mrf.mxu0  ;;  %v3817_v32 = vld [vmem:[%s7825_s5 + $0xf8] sm:$0xf0]  ;;  %v7471_v54 = vpop.f32.mrf.mxu1 }
 0x1e2   :  { %v5273_v14 = vld [vmem:[%s7825_s5 + $0x6dc] sm:$0xf] }
 0x1e3   :  { %2592 = vmatpush.bf16.msra.mxu2 %v3720_v36  ;;  %2616 = vmatpush.bf16.msrb.mxu0 %v4360_v37  ;;  %v4457_v36 = vld [vmem:[%s7825_s5 + $0x5f8] sm:$0xf0]  ;;  %v4044_v37 = vor.u32 %v5137_v21, %v4041_v22 }
 0x1e4   :  { %v4585_v15 = vld [vmem:[%s7825_s5 + $0x6f8] sm:$0xf0] }
 0x1e5   :  { %2656 = vmatpush.bf16.msrb.mxu3 %v4172_v33  ;;  %2632 = vmatpush.bf16.msrb.mxu1 %v4552_v50  ;;  %v5241_v33 = vld [vmem:[%s7825_s5 + $0x5dc] sm:$0xf] }
 0x1e6   :  { %2593 = vmatmul.bf16.vlgmr.msra.gmra.mxu2 %v6374_v40  ;;  %v4460_v48 = vor.u32 %v5241_v33, %v4457_v36  ;;  %v5073_v50 = vld [vmem:[%s7825_s5 + $0x9c] sm:$0xf] }
 0x1e7   :  { %2641 = vmatpush.bf16.msrb.mxu2 %v3948_v44  ;;  %2617 = vmatpush.bf16.msrb.mxu0 %v4328_v52  ;;  %v3820_v44 = vor.u32 %v5081_v31, %v3817_v32  ;;  %v5233_v52 = vld [vmem:[%s7825_s5 + $0x59c] sm:$0xf] }
 0x1e8   :  { %v5217_v21 = vld [vmem:[%s7825_s5 + $0x51c] sm:$0xf] }
 0x1e9   :  { %2657 = vmatpush.bf16.msrb.mxu3 %v4140_v51  ;;  %2633 = vmatpush.bf16.msrb.mxu1 %v4520_v63  ;;  %v3785_v51 = vld [vmem:[%s7825_s5 + $0xb8] sm:$0xf0]  ;;  %v7475_v57 = vpop.f32.mrf.mxu0  ;;  %v4428_v63 = vor.u32 %v5233_v52, %v4425_v53  ;;  %v7528_v27 = vpop.f32.mrf.mxu1  ;;  %v5322_v53 = vld [vmem:[%s7827_s7 + $0x60] sm:$0xff] }
 0x1ea   :  { %v3788_v59 = vor.u32 %v5073_v50, %v3785_v51  ;;  %v4361_v22 = vld [vmem:[%s7825_s5 + $0x538] sm:$0xf0]  ;;  %v7569_v50 = vld [vmem:[%s7826_s6] sm:$0xff] }
 0x1eb   :  { %2642 = vmatpush.bf16.msrb.mxu2 %v3916_v56  ;;  %2618 = vmatpush.bf16.msrb.mxu0 %v4296_v3  ;;  %v7473_v56 = vpop.f32.mrf.mxu2  ;;  %v5065_v3 = vld [vmem:[%s7825_s5 + $0x5c] sm:$0xf]  ;;  %v4364_v29 = vor.u32 %v5217_v21, %v4361_v22 }
 0x1ec   :  { %v3756_v11 = vor.u32 %v5065_v3, %v3753_v4  ;;  %v5265_v30 = vld [vmem:[%s7825_s5 + $0x69c] sm:$0xf] }
 0x1ed   :  { %2658 = vmatpush.bf16.msrb.mxu3 %v4108_v2  ;;  %2634 = vmatpush.bf16.msrb.mxu1 %v4488_v18  ;;  %v4617_v2 = vld [vmem:[%s7825_s5 + $0x738] sm:$0xf0] }
 0x1ee   :  { %v4620_v8 = vor.u32 %v5281_v0, %v4617_v2  ;;  %v5057_v18 = vld [vmem:[%s7825_s5 + $0x1c] sm:$0xf] }
 0x1ef   :  { %2643 = vmatpush.bf16.msrb.mxu2 %v3884_v7  ;;  %2619 = vmatpush.bf16.msrb.mxu0 %v4264_v24  ;;  %v3980_v7 = vor.u32 %v5121_v60, %v3977_v61  ;;  %v4588_v24 = vor.u32 %v5273_v14, %v4585_v15  ;;  %v4553_v31 = vld [vmem:[%s7825_s5 + $0x6b8] sm:$0xf0]  ;;  %v954_v60 = vperm.slane %v7569_v50, 1  ;;  %v953_v14 = vperm.slane %v7569_v50, 0 }
 0x1f0   :  { %2635 = vmatmul.bf16.vlgmr.msrb.gmra.mxu1 %v6417_v10  ;;  %v5317_v36 = vld [vmem:[%s7827_s7 + $0x38] sm:$0xff] }
 0x1f1   :  { %2659 = vmatpush.bf16.msrb.mxu3 %v4076_v19  ;;  %2683 = vmatpush.bf16.msra.mxu1 %v4716_v20  ;;  %v7514_v19 = vpop.f32.mrf.mxu3  ;;  %v3721_v20 = vld [vmem:[%s7825_s5 + $0x38] sm:$0xf0]  ;;  %v2344_v33 = vpop.f32.mrf.mxu0  ;;  %v2317_v2 = vadd.f32 %v7473_v56, %v954_v60 }
 0x1f2   :  { %v3724_v28 = vor.u32 %v5057_v18, %v3721_v20  ;;  %v5257_v45 = vld [vmem:[%s7825_s5 + $0x65c] sm:$0xf]  ;;  %v7593_v0 = vpop.f32.mrf.mxu1  ;;  %v5320_v18 = vld [vmem:[%s7827_s7 + $0x50] sm:$0xff] }
 0x1f3   :  { %2644 = vmatpush.bf16.msrb.mxu2 %v3852_v25  ;;  %2620 = vmatpush.bf16.msrb.mxu0 %v4232_v41  ;;  %v5324_v25 = vld [vmem:[%s7827_s7 + $0x70] sm:$0xff]  ;;  %v7536_v32 = vpop.f32.mrf.mxu2  ;;  %v4556_v41 = vor.u32 %v5265_v30, %v4553_v31  ;;  %v4521_v46 = vld [vmem:[%s7825_s5 + $0x678] sm:$0xf0]  ;;  %v2331_v15 = vadd.f32 %v7514_v19, %v2317_v2 }
 0x1f4   :  { %v4297_v49 = vld [vmem:[%s7825_s5 + $0x4b8] sm:$0xf0]  ;;  %v4524_v52 = vor.u32 %v5257_v45, %v4521_v46  ;;  %v5311_v45 = vld [vmem:[%s7827_s7 + $0x8] sm:$0xff] }
 0x1f5   :  { %2660 = vmatpush.bf16.msrb.mxu3 %v4044_v37  ;;  %2684 = vmatpush.bf16.msra.mxu1 %v4684_v38  ;;  %v5209_v37 = vld [vmem:[%s7825_s5 + $0x4dc] sm:$0xf]  ;;  %v2345_v22 = vadd.f32 %v2344_v33, %v2331_v15  ;;  %v5319_v33 = vld [vmem:[%s7827_s7 + $0x48] sm:$0xff] }
 0x1f6   :  { %2621 = vmatmul.bf16.vlgmr.msrb.gmra.mxu0 %v6457_v34  ;;  %v4329_v38 = vld [vmem:[%s7825_s5 + $0x4f8] sm:$0xf0] }
 0x1f7   :  { %2645 = vmatpush.bf16.msrb.mxu2 %v3820_v44  ;;  %2669 = vmatpush.bf16.msra.mxu0 %v4460_v48  ;;  %v4332_v44 = vor.u32 %v5209_v37, %v4329_v38  ;;  %v5201_v48 = vld [vmem:[%s7825_s5 + $0x49c] sm:$0xf] }
 0x1f8   :  { %v5193_v61 = vld [vmem:[%s7825_s5 + $0x45c] sm:$0xf] }
 0x1f9   :  { %2661 = vmatpush.bf16.msrb.mxu3 %v4012_v55  ;;  %2685 = vmatpush.bf16.msra.mxu1 %v4652_v58  ;;  %v7571_v51 = vpop.f32.mrf.mxu3  ;;  %v4300_v55 = vor.u32 %v5201_v48, %v4297_v49  ;;  %v5249_v58 = vld [vmem:[%s7825_s5 + $0x61c] sm:$0xf]  ;;  %v7598_v4 = vpop.f32.mrf.mxu0 }
 0x1fa   :  { %v5321_v6 = vld [vmem:[%s7827_s7 + $0x58] sm:$0xff]  ;;  %v7638_v31 = vpop.f32.mrf.mxu1 }
 0x1fb   :  { %2646 = vmatpush.bf16.msrb.mxu2 %v3788_v59  ;;  %2670 = vmatpush.bf16.msra.mxu0 %v4428_v63  ;;  %v4489_v59 = vld [vmem:[%s7825_s5 + $0x638] sm:$0xf0]  ;;  %v7596_v3 = vpop.f32.mrf.mxu2 }
 0x1fc   :  { %v4265_v63 = vld [vmem:[%s7825_s5 + $0x478] sm:$0xf0]  ;;  %v4492_v5 = vor.u32 %v5249_v58, %v4489_v59  ;;  %v5330_v58 = vld [vmem:[%s7827_s7 + $0xa0] sm:$0xff] }
 0x1fd   :  { %2662 = vmatpush.bf16.msrb.mxu3 %v3980_v7  ;;  %2686 = vmatpush.bf16.msra.mxu1 %v4620_v8  ;;  %v4268_v7 = vor.u32 %v5193_v61, %v4265_v63  ;;  %v5314_v8 = vld [vmem:[%s7827_s7 + $0x20] sm:$0xff]  ;;  %v5341_v56 = vld [vmem:[%s7827_s7 + $0xf8] sm:$0xff] }
 0x1fe   :  { %v5313_v19 = vld [vmem:[%s7827_s7 + $0x18] sm:$0xff] }
 0x1ff   :  { %2647 = vmatpush.bf16.msrb.mxu2 %v3756_v11  ;;  %2671 = vmatpush.bf16.msra.mxu0 %v4396_v13  ;;  %v5185_v11 = vld [vmem:[%s7825_s5 + $0x41c] sm:$0xf] }
 0x200   :  { %2663 = vmatmul.bf16.vlgmr.msrb.gmra.mxu3 %v6352_v23  ;;  %v5323_v23 = vld [vmem:[%s7827_s7 + $0x68] sm:$0xff]  ;;  %v4233_v13 = vld [vmem:[%s7825_s5 + $0x438] sm:$0xf0]  ;;  %s5406_s5 = smov 8  }
 0x201   :  { %3251 = vmatpush.bf16.msra.mxu3 %v5325_v9  ;;  %2687 = vmatpush.bf16.msra.mxu1 %v4588_v24  ;;  %v2315_v9 = vadd.f32 %v7410_v16, %v954_v60  ;;  %v2261_v16 = vadd.f32 %v7331_v42, %v953_v14  ;;  %v4236_v20 = vor.u32 %v5185_v11, %v4233_v13  ;;  %v7623_v24 = vpop.f32.mrf.mxu3  ;;  %v5333_v42 = vld [vmem:[%s7827_s7 + $0xb8] sm:$0xff]  ;;  %v955_v60 = vperm.slane %v7569_v50, 2 }
 0x203   :  { %2648 = vmatpush.bf16.msrb.mxu2 %v3724_v28  ;;  %2672 = vmatpush.bf16.msra.mxu0 %v4364_v29  ;;  %v2329_v21 = vadd.f32 %v7444_v39, %v2315_v9  ;;  %v5340_v39 = vld [vmem:[%s7827_s7 + $0xf0] sm:$0xff]  ;;  %v2275_v30 = vadd.f32 %v7375_v62, %v2261_v16  ;;  %v2373_v63 = vadd.f32 %v7596_v3, %v955_v60 }
 0x204   :  { %v5332_v62 = vld [vmem:[%s7827_s7 + $0xb0] sm:$0xff] }
 0x205   :  { %3252 = vmatpush.bf16.msra.mxu3 %v5324_v25  ;;  %2688 = vmatpush.bf16.msra.mxu1 %v4556_v41  ;;  %v2259_v25 = vadd.f32 %v7258_v1, %v953_v14  ;;  %v2343_v28 = vadd.f32 %v7475_v57, %v2329_v21  ;;  %v2359_v1 = vadd.f32 %v7528_v27, %v2345_v22  ;;  %v5312_v57 = vld [vmem:[%s7827_s7 + $0x10] sm:$0xff]  ;;  %v5339_v27 = vld [vmem:[%s7827_s7 + $0xe8] sm:$0xff] }
 0x206   :  { %2649 = vmatmul.bf16.vlgmr.msrb.gmra.mxu2 %v6374_v40  ;;  %v5315_v40 = vld [vmem:[%s7827_s7 + $0x28] sm:$0xff]  ;;  %v2289_v37 = vadd.f32 %v7412_v17, %v2275_v30  ;;  %v956_v17 = vperm.slane %v7569_v50, 3  ;;  %v5336_v9 = vld [vmem:[%s7827_s7 + $0xd0] sm:$0xff]  ;;  %v2387_v13 = vadd.f32 %v7623_v24, %v2373_v63  ;;  %v5346_v30 = vld [vmem:[%s7827_s7 + $0x120] sm:$0xff] }
 0x207   :  { %3237 = vmatpush.bf16.msra.mxu2 %v5317_v36  ;;  %2673 = vmatpush.bf16.msra.mxu0 %v4332_v44  ;;  %v2273_v36 = vadd.f32 %v7303_v26, %v2259_v25  ;;  %v2357_v38 = vadd.f32 %v7471_v54, %v2343_v28  ;;  %v2706_v44 = vmax.f32 %v2359_v1, 0.0  ;;  %v5338_v54 = vld [vmem:[%s7827_s7 + $0xe0] sm:$0xff]  ;;  %v5348_v3 = vld [vmem:[%s7827_s7 + $0x130] sm:$0xff]  ;;  %v5335_v21 = vld [vmem:[%s7827_s7 + $0xc8] sm:$0xff] }
 0x208   :  { %v5347_v22 = vld [vmem:[%s7827_s7 + $0x128] sm:$0xff]  ;;  %v5350_v63 = vld [vmem:[%s7827_s7 + $0x140] sm:$0xff] }
 0x209   :  { %3253 = vmatpush.bf16.msra.mxu3 %v5323_v23  ;;  %2689 = vmatpush.bf16.msra.mxu1 %v4524_v52  ;;  %v2426_v29 = vpop.f32.mrf.mxu2  ;;  %v2287_v41 = vadd.f32 %v7333_v43, %v2273_v36  ;;  %v5318_v23 = vld [vmem:[%s7827_s7 + $0x40] sm:$0xff]  ;;  %v2440_v26 = vpop.f32.mrf.mxu3  ;;  %v2303_v43 = vadd.f32 %v7399_v12, %v2289_v37  ;;  %v2698_v46 = vmax.f32 %v2357_v38, 0.0  ;;  %v5356_v36 = vld [vmem:[%s7827_s7 + $0x170] sm:$0xff] }
 0x20a   :  { %v2427_v52 = vadd.f32 %v2426_v29, %v956_v17  ;;  %v5310_v12 = vld [vmem:[%s7827_s7] sm:$0xff]  ;;  %v5344_v38 = vld [vmem:[%s7827_s7 + $0x110] sm:$0xff] }
 0x20b   :  { %3238 = vmatpush.bf16.msra.mxu2 %v5316_v47  ;;  %2674 = vmatpush.bf16.msra.mxu0 %v4300_v55  ;;  %v2301_v47 = vadd.f32 %v7320_v35, %v2287_v41  ;;  %v2714_v49 = vpack.c.bf16 %v2706_v44, %v2698_v46  ;;  %v2705_v59 = vmax.f32 %v2303_v43, 0.0  ;;  %v5337_v35 = vld [vmem:[%s7827_s7 + $0xd8] sm:$0xff]  ;;  %v5334_v29 = vld [vmem:[%s7827_s7 + $0xc0] sm:$0xff]  ;;  %v5355_v41 = vld [vmem:[%s7827_s7 + $0x168] sm:$0xff] }
 0x20c   :  { %v5343_v44 = vld [vmem:[%s7827_s7 + $0x108] sm:$0xff]  ;;  %v5342_v43 = vld [vmem:[%s7827_s7 + $0x100] sm:$0xff] }
 0x20d   :  { %3254 = vmatpush.bf16.msra.mxu3 %v5322_v53  ;;  %2690 = vmatpush.bf16.msra.mxu1 %v4492_v5  ;;  %v2468_v48 = vpop.f32.mrf.mxu1  ;;  %v2697_v61 = vmax.f32 %v2301_v47, 0.0  ;;  %v2441_v5 = vadd.f32 %v2440_v26, %v2427_v52  ;;  %v5353_v47 = vld [vmem:[%s7827_s7 + $0x158] sm:$0xff]  ;;  %v5352_v52 = vld [vmem:[%s7827_s7 + $0x150] sm:$0xff] }
 0x20f   :  { %3239 = vmatpush.bf16.msra.mxu2 %v5315_v40  ;;  %2675 = vmatpush.bf16.msra.mxu0 %v4268_v7  ;;  %v5349_v40 = vld [vmem:[%s7827_s7 + $0x138] sm:$0xff]  ;;  %v2713_v7 = vpack.c.bf16 %v2705_v59, %v2697_v61  ;;  %v5351_v59 = vld [vmem:[%s7827_s7 + $0x148] sm:$0xff] }
 0x210   :  { %2691 = vmatmul.bf16.vlgmr.msra.gmra.mxu1 %v6417_v10  ;;  %v7644_v10 = vpop.f32.mrf.mxu0 }
 0x211   :  { %3255 = vmatpush.bf16.msra.mxu3 %v5321_v6  ;;  %3279 = vmatpush.bf16.msrb.mxu1 %v5341_v56  ;;  %v2428_v53 = vpop.f32.mrf.mxu2  ;;  %v5329_v6 = vld [vmem:[%s7827_s7 + $0x98] sm:$0xff]  ;;  %v2442_v56 = vpop.f32.mrf.mxu3 }
 0x212   :  { %v2429_v2 = vadd.f32 %v2428_v53, %v956_v17  ;;  %v5354_v17 = vld [vmem:[%s7827_s7 + $0x160] sm:$0xff] }
 0x213   :  { %3240 = vmatpush.bf16.msra.mxu2 %v5314_v8  ;;  %2676 = vmatpush.bf16.msra.mxu0 %v4236_v20  ;;  %v2371_v8 = vadd.f32 %v7536_v32, %v955_v60  ;;  %v5328_v32 = vld [vmem:[%s7827_s7 + $0x90] sm:$0xff] }
 0x214   :  { %v2443_v14 = vadd.f32 %v2442_v56, %v2429_v2  ;;  %v958_v56 = vperm.slane %v7569_v50, 5 }
 0x215   :  { %3256 = vmatpush.bf16.msra.mxu3 %v5320_v18  ;;  %3280 = vmatpush.bf16.msrb.mxu1 %v5340_v39  ;;  %v2385_v16 = vadd.f32 %v7571_v51, %v2371_v8  ;;  %v2401_v18 = vadd.f32 %v7644_v10, %v2387_v13  ;;  %v5327_v51 = vld [vmem:[%s7827_s7 + $0x88] sm:$0xff]  ;;  %v5326_v10 = vld [vmem:[%s7827_s7 + $0x80] sm:$0xff]  ;;  %v5364_v8 = vld [vmem:[%s7827_s7 + $0x1b0] sm:$0xff] }
 0x216   :  { %2677 = vmatmul.bf16.vlgmr.msra.gmra.mxu0 %v6457_v34  ;;  %v5331_v34 = vld [vmem:[%s7827_s7 + $0xa8] sm:$0xff] }
 0x217   :  { %3241 = vmatpush.bf16.msra.mxu2 %v5313_v19  ;;  %3265 = vmatpush.bf16.msrb.mxu0 %v5333_v42  ;;  %v2470_v19 = vpop.f32.mrf.mxu1  ;;  %v2399_v42 = vadd.f32 %v7598_v4, %v2385_v16  ;;  %v2415_v39 = vadd.f32 %v7638_v31, %v2401_v18  ;;  %v5357_v4 = vld [vmem:[%s7827_s7 + $0x178] sm:$0xff] }
 0x218   :  { %v2454_v55 = vpop.f32.mrf.mxu0 }
 0x219   :  { %3257 = vmatpush.bf16.msra.mxu3 %v5319_v33  ;;  %3281 = vmatpush.bf16.msrb.mxu1 %v5339_v27  ;;  %v2455_v11 = vadd.f32 %v2454_v55, %v2441_v5  ;;  %v2413_v1 = vadd.f32 %v7593_v0, %v2399_v42 }
 0x21b   :  { %3242 = vmatpush.bf16.msra.mxu2 %v5312_v57  ;;  %3266 = vmatpush.bf16.msrb.mxu0 %v5332_v62  ;;  %v2469_v24 = vadd.f32 %v2468_v48, %v2455_v11  ;;  %v2707_v57 = vmax.f32 %v2415_v39, 0.0  ;;  %v5345_v62 = vld [vmem:[%s7827_s7 + $0x118] sm:$0xff]  ;;  %v2699_v37 = vmax.f32 %v2413_v1, 0.0  ;;  %v5362_v11 = vld [vmem:[%s7827_s7 + $0x1a0] sm:$0xff] }
 0x21d   :  { %3258 = vmatpush.bf16.msra.mxu3 %v5318_v23  ;;  %3282 = vmatpush.bf16.msrb.mxu1 %v5338_v54  ;;  %v2700_v33 = vmax.f32 %v2469_v24, 0.0  ;;  %v2715_v27 = vpack.c.bf16 %v2707_v57, %v2699_v37  ;;  %v957_v23 = vperm.slane %v7569_v50, 4  ;;  %v5372_v57 = vld [vmem:[%s7827_s7 + $0x1f0] sm:$0xff]  ;;  %v5370_v37 = vld [vmem:[%s7827_s7 + $0x1e0] sm:$0xff] }
 0x21f   :  { %3243 = vmatpush.bf16.msra.mxu2 %v5311_v45  ;;  %3267 = vmatpush.bf16.msrb.mxu0 %v5331_v34 }
 0x220   :  { %3259 = vmatmul.bf16.vlgmr.msra.gmra.mxu3 %v2714_v49  ;;  %v2456_v15 = vpop.f32.mrf.mxu0 }
 0x221   :  { %3283 = vmatpush.bf16.msrb.mxu1 %v5337_v35  ;;  %v2457_v20 = vadd.f32 %v2456_v15, %v2443_v14  ;;  %3307 = vmatpush.bf16.msrb.mxu3 %v5357_v4  ;;  %v5358_v4 = vld [vmem:[%s7827_s7 + $0x180] sm:$0xff] }
 0x223   :  { %3244 = vmatpush.bf16.msra.mxu2 %v5310_v12  ;;  %3268 = vmatpush.bf16.msrb.mxu0 %v5330_v58  ;;  %v2471_v25 = vadd.f32 %v2470_v19, %v2457_v20  ;;  %v2496_v26 = vpop.f32.mrf.mxu3 }
 0x225   :  { %3284 = vmatpush.bf16.msrb.mxu1 %v5336_v9  ;;  %v2708_v28 = vmax.f32 %v2471_v25, 0.0  ;;  %3308 = vmatpush.bf16.msrb.mxu3 %v5356_v36  ;;  %v5359_v25 = vld [vmem:[%s7827_s7 + $0x188] sm:$0xff] }
 0x226   :  { %3245 = vmatmul.bf16.vlgmr.msra.gmra.mxu2 %v2713_v7  ;;  %v5371_v36 = vld [vmem:[%s7827_s7 + $0x1e8] sm:$0xff] }
 0x227   :  { %3293 = vmatpush.bf16.msrb.mxu2 %v5349_v40  ;;  %3269 = vmatpush.bf16.msrb.mxu0 %v5329_v6  ;;  %v2716_v31 = vpack.c.bf16 %v2708_v28, %v2700_v33  ;;  %v5365_v6 = vld [vmem:[%s7827_s7 + $0x1b8] sm:$0xff] }
 0x228   :  { %v5373_v33 = vld [vmem:[%s7827_s7 + $0x1f8] sm:$0xff] }
 0x229   :  { %3285 = vmatpush.bf16.msrb.mxu1 %v5335_v21  ;;  %v2482_v0 = vpop.f32.mrf.mxu2  ;;  %3309 = vmatpush.bf16.msrb.mxu3 %v5355_v41 }
 0x22a   :  { %v2483_v45 = vadd.f32 %v2482_v0, %v957_v23  ;;  %v959_v0 = vperm.slane %v7569_v50, 6 }
 0x22b   :  { %3294 = vmatpush.bf16.msrb.mxu2 %v5348_v3  ;;  %3270 = vmatpush.bf16.msrb.mxu0 %v5328_v32  ;;  %v2498_v55 = vpop.f32.mrf.mxu3  ;;  %v5363_v3 = vld [vmem:[%s7827_s7 + $0x1a8] sm:$0xff]  ;;  %v5361_v32 = vld [vmem:[%s7827_s7 + $0x198] sm:$0xff] }
 0x22c   :  { %v2497_v49 = vadd.f32 %v2496_v26, %v2483_v45 }
 0x22d   :  { %3286 = vmatpush.bf16.msrb.mxu1 %v5334_v29  ;;  %v2524_v34 = vpop.f32.mrf.mxu1  ;;  %3310 = vmatpush.bf16.msrb.mxu3 %v5354_v17  ;;  %v5368_v17 = vld [vmem:[%s7827_s7 + $0x1d0] sm:$0xff] }
 0x22f   :  { %3295 = vmatpush.bf16.msrb.mxu2 %v5347_v22  ;;  %3271 = vmatpush.bf16.msrb.mxu0 %v5327_v51  ;;  %v5360_v22 = vld [vmem:[%s7827_s7 + $0x190] sm:$0xff] }
 0x230   :  { %3287 = vmatmul.bf16.vlgmr.msrb.gmra.mxu1 %v2716_v31 }
 0x231   :  { %v2484_v54 = vpop.f32.mrf.mxu2  ;;  %3311 = vmatpush.bf16.msrb.mxu3 %v5353_v47  ;;  %3335 = vmatpush.bf16.msra.mxu1 %v5373_v33 }
 0x232   :  { %v2485_v48 = vadd.f32 %v2484_v54, %v957_v23 }
 0x233   :  { %3296 = vmatpush.bf16.msrb.mxu2 %v5346_v30  ;;  %3272 = vmatpush.bf16.msrb.mxu0 %v5326_v10  ;;  %v2510_v46 = vpop.f32.mrf.mxu0 }
 0x234   :  { %v2511_v53 = vadd.f32 %v2510_v46, %v2497_v49  ;;  %v2499_v12 = vadd.f32 %v2498_v55, %v2485_v48  ;;  %v5367_v46 = vld [vmem:[%s7827_s7 + $0x1c8] sm:$0xff]  ;;  %v5366_v55 = vld [vmem:[%s7827_s7 + $0x1c0] sm:$0xff] }
 0x235   :  { %3312 = vmatpush.bf16.msrb.mxu3 %v5352_v52  ;;  %v2526_v40 = vpop.f32.mrf.mxu1  ;;  %3336 = vmatpush.bf16.msra.mxu1 %v5372_v57 }
 0x236   :  { %3273 = vmatmul.bf16.vlgmr.msrb.gmra.mxu0 %v2715_v27  ;;  %v2525_v60 = vadd.f32 %v2524_v34, %v2511_v53 }
 0x237   :  { %3297 = vmatpush.bf16.msrb.mxu2 %v5345_v62  ;;  %3321 = vmatpush.bf16.msra.mxu0 %v5365_v6 }
 0x238   :  { %v2701_v2 = vmax.f32 %v2525_v60, 0.0 }
 0x239   :  { %3313 = vmatpush.bf16.msrb.mxu3 %v5351_v59  ;;  %3337 = vmatpush.bf16.msra.mxu1 %v5371_v36 }
 0x23b   :  { %3298 = vmatpush.bf16.msrb.mxu2 %v5344_v38  ;;  %v2512_v58 = vpop.f32.mrf.mxu0  ;;  %3322 = vmatpush.bf16.msra.mxu0 %v5364_v8  ;;  %v5369_v38 = vld [vmem:[%s7827_s7 + $0x1d8] sm:$0xff] }
 0x23c   :  { %v2513_v35 = vadd.f32 %v2512_v58, %v2499_v12 }
 0x23d   :  { %3314 = vmatpush.bf16.msrb.mxu3 %v5350_v63  ;;  %3338 = vmatpush.bf16.msra.mxu1 %v5370_v37 }
 0x23e   :  { %v2527_v61 = vadd.f32 %v2526_v40, %v2513_v35  ;;  %v960_v40 = vperm.slane %v7569_v50, 7 }
 0x23f   :  { %3299 = vmatpush.bf16.msrb.mxu2 %v5343_v44  ;;  %3323 = vmatpush.bf16.msra.mxu0 %v5363_v3 }
 0x240   :  { %v2709_v5 = vmax.f32 %v2527_v61, 0.0 }
 0x241   :  { %3339 = vmatpush.bf16.msra.mxu1 %v5369_v38 }
 0x242   :  { %v2717_v7 = vpack.c.bf16 %v2709_v5, %v2701_v2 }
 0x243   :  { %3300 = vmatpush.bf16.msrb.mxu2 %v5342_v43  ;;  %v2552_v13 = vpop.f32.mrf.mxu3  ;;  %3324 = vmatpush.bf16.msra.mxu0 %v5362_v11 }
 0x245   :  { %3340 = vmatpush.bf16.msra.mxu1 %v5368_v17 }
 0x246   :  { %3301 = vmatmul.bf16.vlgmr.msrb.gmra.mxu2 %v2717_v7 }
 0x247   :  { %3325 = vmatpush.bf16.msra.mxu0 %v5361_v32 }
 0x249   :  { %v2538_v9 = vpop.f32.mrf.mxu2  ;;  %3341 = vmatpush.bf16.msra.mxu1 %v5367_v46 }
 0x24a   :  { %v2539_v14 = vadd.f32 %v2538_v9, %v958_v56 }
 0x24b   :  { %3326 = vmatpush.bf16.msra.mxu0 %v5360_v22  ;;  %v2554_v19 = vpop.f32.mrf.mxu3 }
 0x24c   :  { %v2553_v21 = vadd.f32 %v2552_v13, %v2539_v14 }
 0x24d   :  { %v2580_v15 = vpop.f32.mrf.mxu1  ;;  %3342 = vmatpush.bf16.msra.mxu1 %v5366_v55 }
 0x24f   :  { %3327 = vmatpush.bf16.msra.mxu0 %v5359_v25 }
 0x251   :  { %v2540_v16 = vpop.f32.mrf.mxu2 }
 0x252   :  { %v2541_v20 = vadd.f32 %v2540_v16, %v958_v56 }
 0x253   :  { %v2566_v18 = vpop.f32.mrf.mxu0  ;;  %3328 = vmatpush.bf16.msra.mxu0 %v5358_v4 }
 0x254   :  { %v2567_v24 = vadd.f32 %v2566_v18, %v2553_v21  ;;  %v2555_v42 = vadd.f32 %v2554_v19, %v2541_v20 }
 0x255   :  { %v2582_v29 = vpop.f32.mrf.mxu1 }
 0x256   :  { %v2581_v39 = vadd.f32 %v2580_v15, %v2567_v24  ;;  %v5377_v24 = vld [vmem:[%s7828_s8] ss:$0 sm:$0xff]  ;;  %s5404_s8 = smov [#allocation2]  }
 0x257   :  { %s3355_s10 = sshll.u32 %s5404_s8, 4  ;;  %s3356_s10 = int_to_ptr.vmem [resolvable:$true] %s3355_s10 }
 0x258   :  { %v2702_v1 = vmax.f32 %v2581_v39, 0.0 }
 0x25b   :  { %v2568_v51 = vpop.f32.mrf.mxu0 }
 0x25c   :  { %v2569_v28 = vadd.f32 %v2568_v51, %v2555_v42 }
 0x25e   :  { %v2583_v30 = vadd.f32 %v2582_v29, %v2569_v28 }
 0x260   :  { %v2710_v31 = vmax.f32 %v2583_v30, 0.0 }
 0x262   :  { %v2718_v10 = vpack.c.bf16 %v2710_v31, %v2702_v1 }
 0x263   :  { %v2608_v27 = vpop.f32.mrf.mxu3 }
 0x264   :  { %3315 = vmatmul.bf16.vlgmr.msrb.gmra.mxu3 %v2718_v10 }
 0x269   :  { %v2594_v62 = vpop.f32.mrf.mxu2 }
 0x26a   :  { %v2595_v41 = vadd.f32 %v2594_v62, %v959_v0 }
 0x26b   :  { %v2610_v54 = vpop.f32.mrf.mxu3 }
 0x26c   :  { %v2609_v34 = vadd.f32 %v2608_v27, %v2595_v41 }
 0x26d   :  { %v2636_v23 = vpop.f32.mrf.mxu1 }
 0x271   :  { %v2596_v44 = vpop.f32.mrf.mxu2 }
 0x272   :  { %v2597_v45 = vadd.f32 %v2596_v44, %v959_v0 }
 0x273   :  { %v2622_v26 = vpop.f32.mrf.mxu0 }
 0x274   :  { %v2623_v43 = vadd.f32 %v2622_v26, %v2609_v34  ;;  %v2611_v47 = vadd.f32 %v2610_v54, %v2597_v45 }
 0x275   :  { %v2638_v53 = vpop.f32.mrf.mxu1 }
 0x276   :  { %v2637_v49 = vadd.f32 %v2636_v23, %v2623_v43 }
 0x278   :  { %v2703_v58 = vmax.f32 %v2637_v49, 0.0 }
 0x27b   :  { %v2624_v48 = vpop.f32.mrf.mxu0 }
 0x27c   :  { %v2625_v52 = vadd.f32 %v2624_v48, %v2611_v47 }
 0x27e   :  { %v2639_v12 = vadd.f32 %v2638_v53, %v2625_v52 }
 0x280   :  { %v2711_v59 = vmax.f32 %v2639_v12, 0.0 }
 0x282   :  { %v2719_v60 = vpack.c.bf16 %v2711_v59, %v2703_v58 }
 0x283   :  { %v2664_v61 = vpop.f32.mrf.mxu3 }
 0x284   :  { %3329 = vmatmul.bf16.vlgmr.msra.gmra.mxu0 %v2719_v60 }
 0x289   :  { %v2650_v35 = vpop.f32.mrf.mxu2 }
 0x28a   :  { %v2651_v63 = vadd.f32 %v2650_v35, %v960_v40 }
 0x28b   :  { %v2666_v3 = vpop.f32.mrf.mxu3 }
 0x28c   :  { %v2665_v8 = vadd.f32 %v2664_v61, %v2651_v63 }
 0x28d   :  { %v2692_v2 = vpop.f32.mrf.mxu1 }
 0x291   :  { %v2652_v5 = vpop.f32.mrf.mxu2 }
 0x292   :  { %v2653_v7 = vadd.f32 %v2652_v5, %v960_v40 }
 0x293   :  { %v2678_v6 = vpop.f32.mrf.mxu0 }
 0x294   :  { %v2679_v9 = vadd.f32 %v2678_v6, %v2665_v8  ;;  %v2667_v56 = vadd.f32 %v2666_v3, %v2653_v7 }
 0x295   :  { %v2694_v15 = vpop.f32.mrf.mxu1 }
 0x296   :  { %v2693_v13 = vadd.f32 %v2692_v2, %v2679_v9 }
 0x298   :  { %v2704_v16 = vmax.f32 %v2693_v13, 0.0 }
 0x29b   :  { %v2680_v11 = vpop.f32.mrf.mxu0 }
 0x29c   :  { %v2681_v14 = vadd.f32 %v2680_v11, %v2667_v56 }
 0x29e   :  { %v2695_v32 = vadd.f32 %v2694_v15, %v2681_v14 }
 0x2a0   :  { %v2712_v18 = vmax.f32 %v2695_v32, 0.0 }
 0x2a2   :  { %v2720_v20 = vpack.c.bf16 %v2712_v18, %v2704_v16 }
 0x2a3   :  { %v3260_v21 = vpop.f32.mrf.mxu3 }
 0x2a4   :  { %3343 = vmatmul.bf16.vlgmr.msra.gmra.mxu1 %v2720_v20 }
 0x2a9   :  { %v3246_v50 = vpop.f32.mrf.mxu2 }
 0x2aa   :  { %v3247_v25 = vadd.f32 %v5377_v24, %v3246_v50 }
 0x2ab   :  { %v3262_v51 = vpop.f32.mrf.mxu3 }
 0x2ac   :  { %v3261_v28 = vadd.f32 %v3260_v21, %v3247_v25 }
 0x2ad   :  { %v3288_v19 = vpop.f32.mrf.mxu1 }
 0x2b1   :  { %v3248_v42 = vpop.f32.mrf.mxu2 }
 0x2b2   :  { %v3249_v4 = vadd.f32 %v5377_v24, %v3248_v42 }
 0x2b3   :  { %v3274_v22 = vpop.f32.mrf.mxu0 }
 0x2b4   :  { %v3275_v29 = vadd.f32 %v3274_v22, %v3261_v28  ;;  %v3263_v57 = vadd.f32 %v3262_v51, %v3249_v4 }
 0x2b5   :  { %v3290_v33 = vpop.f32.mrf.mxu1 }
 0x2b6   :  { %v3289_v31 = vadd.f32 %v3288_v19, %v3275_v29 }
 0x2bb   :  { %v3276_v39 = vpop.f32.mrf.mxu0 }
 0x2bc   :  { %v3277_v36 = vadd.f32 %v3276_v39, %v3263_v57 }
 0x2be   :  { %v3291_v41 = vadd.f32 %v3290_v33, %v3277_v36 }
 0x2c9   :  { %v3302_v30 = vpop.f32.mrf.mxu2 }
 0x2ca   :  { %v3303_v62 = vadd.f32 %v3302_v30, %v3289_v31 }
 0x2d1   :  { %v3304_v27 = vpop.f32.mrf.mxu2 }
 0x2d2   :  { %v3305_v26 = vadd.f32 %v3304_v27, %v3291_v41 }
 0x2e7   :  { %v3316_v1 = vpop.f32.mrf.mxu3 }
 0x2e8   :  { %v3317_v37 = vadd.f32 %v3316_v1, %v3303_v62 }
 0x2ef   :  { %v3318_v44 = vpop.f32.mrf.mxu3 }
 0x2f0   :  { %v3319_v45 = vadd.f32 %v3318_v44, %v3305_v26 }
 0x301   :  { %v3330_v10 = vpop.f32.mrf.mxu0 }
 0x302   :  { %v3331_v0 = vadd.f32 %v3330_v10, %v3317_v37 }
 0x309   :  { %v3332_v17 = vpop.f32.mrf.mxu0 }
 0x30a   :  { %v3333_v34 = vadd.f32 %v3332_v17, %v3319_v45 }
 0x321   :  { %v3344_v38 = vpop.f32.mrf.mxu1 }
 0x322   :  { %v3345_v23 = vadd.f32 %v3344_v38, %v3331_v0 }
 0x324   :  { %3349 = vst [vmem:[#allocation2] sm:$0xff] %v3345_v23 }
 0x329   :  { %v3346_v43 = vpop.f32.mrf.mxu1 }
 0x32a   :  { %v3347_v54 = vadd.f32 %v3346_v43, %v3333_v34 }
 0x32c   :  { %3350 = vst [vmem:[#allocation2 + $0x8] sm:$0xff] %v3347_v54 }
 0x32d   :  { %3363 = dma.vmem_to_hbm [thread:$0]  %s3356_s10, 256, %s3358_s13, [#allocation3], %s5405_s14, %s5405_s14, %s5406_s5  }
 0x32e   :  { %5402 = dma.done.wait [#allocation3], 256  }
 0x32f   :  { %5403 = vsyncadd [#allocation3], 4294967040 }
 0x330   :  { %3368 = vsyncpa [#allocation3], 1 }

</bundles_post_ra>
